<compile_context>
chip_gen: v7x
topology: tpu7x:2x2x1
jax: 0.10.0
libtpu: 0.0.40
codegen_flags: <defaults>
</compile_context>

<pallas_src>
import jax
import jax.numpy as jnp
from jax import lax
from jax.experimental import pallas as pl
from jax.experimental.pallas import tpu as pltpu


def _repvgg_kernel(x_ref, w_ref, b_ref, o_ref, xp_ref):
    # x_ref : (1, H, W, Cin)    unpadded NHWC image (bf16), whole image resident
    # w_ref : (9*Cin, Cout)     re-param weight, im2col K order (dy, dx, cin), bf16
    # b_ref : (1, Cout)         total folded bias, f32
    # o_ref : (1, TH, W, Cout)  output row-block, bf16
    # xp_ref: (TH+2, W+2, Cin)  VMEM scratch: zero-padded halo tile, bf16
    hb = pl.program_id(1)
    nhb = pl.num_programs(1)
    _, TH, W, Cout = o_ref.shape
    Cin = x_ref.shape[3]
    r0 = pl.multiple_of(hb * TH, TH)

    # Build the zero-padded halo tile in VMEM (replaces host-side jnp.pad).
    xp_ref[...] = jnp.zeros_like(xp_ref)
    xp_ref[1:1 + TH, 1:1 + W, :] = x_ref[0, pl.ds(r0, TH), :, :]

    @pl.when(hb > 0)
    def _():
        xp_ref[0:1, 1:1 + W, :] = x_ref[0, pl.ds(r0 - 1, 1), :, :]

    @pl.when(hb < nhb - 1)
    def _():
        xp_ref[TH + 1:TH + 2, 1:1 + W, :] = x_ref[0, pl.ds(r0 + TH, 1), :, :]

    # im2col: one (TH*W, 9*Cin) operand -> a single big-K MXU matmul.
    cols = [xp_ref[dy:dy + TH, dx:dx + W, :].reshape(TH * W, Cin)
            for dy in range(3) for dx in range(3)]
    col = jnp.concatenate(cols, axis=1)                       # (TH*W, 9*Cin)

    acc = jnp.dot(col, w_ref[...], preferred_element_type=jnp.float32)
    acc = acc + b_ref[0]
    # TODO(synk): for small Cout (< 128 lanes, toy Cout=4) the store is masked;
    #             real RepVGG widths (>=128) make this lane-dense automatically.
    o_ref[0] = jnp.maximum(acc, 0.0).reshape(TH, W, Cout).astype(o_ref.dtype)


def repvgg_block(x_nhwc, weq_hwio, bias, *, block_h=8):
    """Fused (re-parameterized) RepVGG block: y = relu(conv3x3(x, weq) + bias).

    x_nhwc:   (N, H, W, Cin)    any float dtype (cast to bf16 internally)
    weq_hwio: (3, 3, Cin, Cout) equivalent 3x3 weight (3x3 + 1x1 + identity)
    bias:     (Cout,)           total folded bias
    Returns (N, H, W, Cout) bf16.
    """
    N, H, W, Cin = x_nhwc.shape
    Cout = weq_hwio.shape[-1]
    if H % block_h != 0:
        block_h = H                       # fall back to one row-block per image
    nhb = H // block_h

    x_bf = x_nhwc.astype(jnp.bfloat16)
    w_bf = weq_hwio.reshape(9 * Cin, Cout).astype(jnp.bfloat16)
    b_f32 = bias.reshape(1, Cout).astype(jnp.float32)

    cost = pl.CostEstimate(
        flops=2 * N * H * W * 9 * Cin * Cout,
        transcendentals=0,
        bytes_accessed=(x_bf.size * 2 + w_bf.size * 2 + b_f32.size * 4
                        + N * H * W * Cout * 2))

    return pl.pallas_call(
        _repvgg_kernel,
        out_shape=jax.ShapeDtypeStruct((N, H, W, Cout), jnp.bfloat16),
        grid=(N, nhb),
        in_specs=[
            pl.BlockSpec((1, H, W, Cin), lambda n, hb: (n, 0, 0, 0)),
            pl.BlockSpec((9 * Cin, Cout), lambda n, hb: (0, 0)),
            pl.BlockSpec((1, Cout), lambda n, hb: (0, 0)),
        ],
        out_specs=pl.BlockSpec((1, block_h, W, Cout),
                               lambda n, hb: (n, hb, 0, 0)),
        scratch_shapes=[
            pltpu.VMEM((block_h + 2, W + 2, Cin), jnp.bfloat16),
        ],
        compiler_params=pltpu.CompilerParams(
            dimension_semantics=("parallel", "parallel"),
            vmem_limit_bytes=32 * 1024 * 1024),
        cost_estimate=cost,
    )(x_bf, w_bf, b_f32)


def fold_bn(w_oihw, gamma, beta, mean, var, eps=1e-5):
    """Fold eval-mode BN into a (Cout, Cin, kh, kw) conv weight -> (w', b')."""
    scale = gamma / jnp.sqrt(var + eps)
    return w_oihw * scale[:, None, None, None], beta - mean * scale


if __name__ == "__main__":
    # RepVGGBlock(in_channels=4, out_channels=4, kernel_size=3, stride=1,
    #             padding=1, deploy=False), eval mode.
    N, Cin, Cout, H, W = 2, 4, 4, 16, 16
    eps = 1e-5

    keys = jax.random.split(jax.random.PRNGKey(0), 6)

    # PyTorch-layout conv weights (Cout, Cin, kh, kw), bias=False.
    w3_pt = 0.1 * jax.random.normal(keys[0], (Cout, Cin, 3, 3), jnp.float32)
    w1_pt = 0.1 * jax.random.normal(keys[1], (Cout, Cin, 1, 1), jnp.float32)

    def bn_params(k, c):
        k0, k1, k2, k3 = jax.random.split(k, 4)
        gamma = 1.0 + 0.1 * jax.random.normal(k0, (c,), jnp.float32)
        beta = 0.1 * jax.random.normal(k1, (c,), jnp.float32)
        mean = 0.1 * jax.random.normal(k2, (c,), jnp.float32)
        var = jnp.abs(jax.random.normal(k3, (c,), jnp.float32)) + 0.5
        return gamma, beta, mean, var

    g3, b3, m3, v3 = bn_params(keys[2], Cout)
    g1, b1, m1, v1 = bn_params(keys[3], Cout)
    gid, bid, mid, vid = bn_params(keys[4], Cin)

    # Per-branch eval-mode BN folding.
    w3f, bias3 = fold_bn(w3_pt, g3, b3, m3, v3, eps)     # (Cout,Cin,3,3), (Cout,)
    w1f, bias1 = fold_bn(w1_pt, g1, b1, m1, v1, eps)
    sid = gid / jnp.sqrt(vid + eps)                      # identity branch (Cin==Cout)
    bias_id = bid - mid * sid

    # RepVGG re-parameterization: fold 1x1 + identity into the 3x3 centre tap.
    w3_hwio = jnp.transpose(w3f, (2, 3, 1, 0))           # (3, 3, Cin, Cout)
    w1_io = jnp.transpose(w1f[:, :, 0, 0], (1, 0))       # (Cin, Cout)
    weq = w3_hwio.at[1, 1].add(w1_io + jnp.diag(sid))    # (3, 3, Cin, Cout)
    bias_eq = bias3 + bias1 + bias_id                    # (Cout,)

    # Input (PyTorch NCHW -> NHWC at the boundary).
    x_nchw = jax.random.normal(keys[5], (N, Cin, H, W), jnp.float32)
    x_nhwc = jnp.transpose(x_nchw, (0, 2, 3, 1))

    # Sanity check: fused conv == sum of the three branches (f32, high precision).
    dn = ("NHWC", "HWIO", "NHWC")
    hi = lax.Precision.HIGHEST
    dense = lax.conv_general_dilated(x_nhwc, w3_hwio, (1, 1), [(1, 1), (1, 1)],
                                     dimension_numbers=dn, precision=hi) + bias3
    one = lax.conv_general_dilated(x_nhwc, w1_io[None, None], (1, 1),
                                   [(0, 0), (0, 0)], dimension_numbers=dn,
                                   precision=hi) + bias1
    ident = x_nhwc * sid + bias_id
    branch_ref = jnp.maximum(dense + one + ident, 0.0)
    fused_ref = jnp.maximum(
        lax.conv_general_dilated(x_nhwc, weq, (1, 1), [(1, 1), (1, 1)],
                                 dimension_numbers=dn, precision=hi) + bias_eq,
        0.0)
    assert jnp.allclose(fused_ref, branch_ref, atol=1e-4, rtol=1e-4), \
        "re-parameterization mismatch"

    # Run the Pallas kernel (bf16 in / bf16 out, f32 accumulation).
    out = repvgg_block(x_nhwc, weq, bias_eq, block_h=8)
    out = jax.block_until_ready(out)
    assert out.shape == (N, H, W, Cout)

    # Reference using the same bf16-rounded operands (tolerance loosened for bf16).
    x_bf = x_nhwc.astype(jnp.bfloat16).astype(jnp.float32)
    w_bf = weq.astype(jnp.bfloat16).astype(jnp.float32)
    ref = jnp.maximum(
        lax.conv_general_dilated(x_bf, w_bf, (1, 1), [(1, 1), (1, 1)],
                                 dimension_numbers=dn, precision=hi) + bias_eq,
        0.0)
    err = jnp.max(jnp.abs(out.astype(jnp.float32) - ref))
    assert jnp.allclose(out.astype(jnp.float32), ref, atol=2e-2, rtol=2e-2), \
        f"max err {err}"

    print("KERNEL_OK")
</pallas_src>

<mosaic_0001>
module attributes {stable_mosaic.version = 11 : i64} {
  func.func @_repvgg_kernel(%arg0: i32, %arg1: i32, %arg2: memref<1x16x16x4xbf16, #tpu.memory_space<vmem>>, %arg3: memref<36x4xbf16, #tpu.memory_space<vmem>>, %arg4: memref<1x4xf32, #tpu.memory_space<vmem>>, %arg5: memref<1x8x16x4xbf16, #tpu.memory_space<vmem>>, %arg6: memref<10x18x4xbf16, #tpu.memory_space<vmem>>) attributes {dimension_semantics = [#tpu.dimension_semantics<parallel>, #tpu.dimension_semantics<parallel>], iteration_bounds = array<i64: 2, 2>, scalar_prefetch = 0 : i64, scratch_operands = 1 : i64, tpu.core_type = #tpu.core_type<tc>, window_params = [{transform_indices = @transform_0, window_bounds = array<i64: 1, 16, 16, 4>}, {pipeline_mode = #tpu.pipeline_mode<synchronous>, transform_indices = @transform_1, window_bounds = array<i64: 36, 4>}, {pipeline_mode = #tpu.pipeline_mode<synchronous>, transform_indices = @transform_2, window_bounds = array<i64: 1, 4>}, {transform_indices = @transform_3, window_bounds = array<i64: 1, 8, 16, 4>}]} {
    %c8_i32 = arith.constant 8 : i32
    %0 = arith.muli %arg1, %c8_i32 : i32
    %1 = tpu.assume_multiple %0, 8 : i32
    %cst = arith.constant 0.000000e+00 : bf16
    %2 = vector.broadcast %cst : bf16 to vector<10x18x4xbf16>
    %c0 = arith.constant 0 : index
    %c0_0 = arith.constant 0 : index
    %c0_1 = arith.constant 0 : index
    %3 = vector.load %arg6[%c0, %c0_0, %c0_1] : memref<10x18x4xbf16, #tpu.memory_space<vmem>>, vector<10x18x4xbf16>
    tpu.vector_store %arg6[%c0, %c0_0, %c0_1], %2 {strides = array<i32>} : memref<10x18x4xbf16, #tpu.memory_space<vmem>>, vector<10x18x4xbf16>,
    %c0_2 = arith.constant 0 : index
    %4 = arith.index_cast %1 : i32 to index
    %c0_3 = arith.constant 0 : index
    %c0_4 = arith.constant 0 : index
    %5 = vector.load %arg2[%c0_2, %4, %c0_3, %c0_4] : memref<1x16x16x4xbf16, #tpu.memory_space<vmem>>, vector<1x8x16x4xbf16>
    %6 = vector.shape_cast %5 : vector<1x8x16x4xbf16> to vector<8x16x4xbf16>
    %c1 = arith.constant 1 : index
    %c1_5 = arith.constant 1 : index
    %c0_6 = arith.constant 0 : index
    %7 = vector.load %arg6[%c1, %c1_5, %c0_6] : memref<10x18x4xbf16, #tpu.memory_space<vmem>>, vector<8x16x4xbf16>
    tpu.vector_store %arg6[%c1, %c1_5, %c0_6], %6 {strides = array<i32>} : memref<10x18x4xbf16, #tpu.memory_space<vmem>>, vector<8x16x4xbf16>,
    %c0_i32 = arith.constant 0 : i32
    %8 = arith.cmpi sgt, %arg1, %c0_i32 : i32
    %9 = arith.extui %8 : i1 to i32
    %c0_i32_7 = arith.constant 0 : i32
    %10 = arith.cmpi ne, %9, %c0_i32_7 : i32
    scf.if %10 {
      %c1_i32_45 = arith.constant 1 : i32
      %47 = arith.subi %1, %c1_i32_45 : i32
      %c0_46 = arith.constant 0 : index
      %48 = arith.index_cast %47 : i32 to index
      %c0_47 = arith.constant 0 : index
      %c0_48 = arith.constant 0 : index
      %49 = vector.load %arg2[%c0_46, %48, %c0_47, %c0_48] : memref<1x16x16x4xbf16, #tpu.memory_space<vmem>>, vector<1x1x16x4xbf16>
      %50 = vector.shape_cast %49 : vector<1x1x16x4xbf16> to vector<1x16x4xbf16>
      %c0_49 = arith.constant 0 : index
      %c1_50 = arith.constant 1 : index
      %c0_51 = arith.constant 0 : index
      %51 = vector.load %arg6[%c0_49, %c1_50, %c0_51] : memref<10x18x4xbf16, #tpu.memory_space<vmem>>, vector<1x16x4xbf16>
      tpu.vector_store %arg6[%c0_49, %c1_50, %c0_51], %50 {strides = array<i32>} : memref<10x18x4xbf16, #tpu.memory_space<vmem>>, vector<1x16x4xbf16>,
    } else {
    }
    %c1_i32 = arith.constant 1 : i32
    %11 = arith.cmpi slt, %arg1, %c1_i32 : i32
    %12 = arith.extui %11 : i1 to i32
    %c0_i32_8 = arith.constant 0 : i32
    %13 = arith.cmpi ne, %12, %c0_i32_8 : i32
    scf.if %13 {
      %c8_i32_45 = arith.constant 8 : i32
      %47 = arith.addi %1, %c8_i32_45 : i32
      %c0_46 = arith.constant 0 : index
      %48 = arith.index_cast %47 : i32 to index
      %c0_47 = arith.constant 0 : index
      %c0_48 = arith.constant 0 : index
      %49 = vector.load %arg2[%c0_46, %48, %c0_47, %c0_48] : memref<1x16x16x4xbf16, #tpu.memory_space<vmem>>, vector<1x1x16x4xbf16>
      %50 = vector.shape_cast %49 : vector<1x1x16x4xbf16> to vector<1x16x4xbf16>
      %c9 = arith.constant 9 : index
      %c1_49 = arith.constant 1 : index
      %c0_50 = arith.constant 0 : index
      %51 = vector.load %arg6[%c9, %c1_49, %c0_50] : memref<10x18x4xbf16, #tpu.memory_space<vmem>>, vector<1x16x4xbf16>
      tpu.vector_store %arg6[%c9, %c1_49, %c0_50], %50 {strides = array<i32>} : memref<10x18x4xbf16, #tpu.memory_space<vmem>>, vector<1x16x4xbf16>,
    } else {
    }
    %c0_9 = arith.constant 0 : index
    %c0_10 = arith.constant 0 : index
    %c0_11 = arith.constant 0 : index
    %14 = vector.load %arg6[%c0_9, %c0_10, %c0_11] : memref<10x18x4xbf16, #tpu.memory_space<vmem>>, vector<8x16x4xbf16>
    %15 = vector.shape_cast %14 : vector<8x16x4xbf16> to vector<128x4xbf16>
    %c0_12 = arith.constant 0 : index
    %c1_13 = arith.constant 1 : index
    %c0_14 = arith.constant 0 : index
    %16 = vector.load %arg6[%c0_12, %c1_13, %c0_14] : memref<10x18x4xbf16, #tpu.memory_space<vmem>>, vector<8x16x4xbf16>
    %17 = vector.shape_cast %16 : vector<8x16x4xbf16> to vector<128x4xbf16>
    %c0_15 = arith.constant 0 : index
    %c2 = arith.constant 2 : index
    %c0_16 = arith.constant 0 : index
    %18 = vector.load %arg6[%c0_15, %c2, %c0_16] : memref<10x18x4xbf16, #tpu.memory_space<vmem>>, vector<8x16x4xbf16>
    %19 = vector.shape_cast %18 : vector<8x16x4xbf16> to vector<128x4xbf16>
    %c1_17 = arith.constant 1 : index
    %c0_18 = arith.constant 0 : index
    %c0_19 = arith.constant 0 : index
    %20 = vector.load %arg6[%c1_17, %c0_18, %c0_19] : memref<10x18x4xbf16, #tpu.memory_space<vmem>>, vector<8x16x4xbf16>
    %21 = vector.shape_cast %20 : vector<8x16x4xbf16> to vector<128x4xbf16>
    %c1_20 = arith.constant 1 : index
    %c1_21 = arith.constant 1 : index
    %c0_22 = arith.constant 0 : index
    %22 = vector.load %arg6[%c1_20, %c1_21, %c0_22] : memref<10x18x4xbf16, #tpu.memory_space<vmem>>, vector<8x16x4xbf16>
    %23 = vector.shape_cast %22 : vector<8x16x4xbf16> to vector<128x4xbf16>
    %c1_23 = arith.constant 1 : index
    %c2_24 = arith.constant 2 : index
    %c0_25 = arith.constant 0 : index
    %24 = vector.load %arg6[%c1_23, %c2_24, %c0_25] : memref<10x18x4xbf16, #tpu.memory_space<vmem>>, vector<8x16x4xbf16>
    %25 = vector.shape_cast %24 : vector<8x16x4xbf16> to vector<128x4xbf16>
    %c2_26 = arith.constant 2 : index
    %c0_27 = arith.constant 0 : index
    %c0_28 = arith.constant 0 : index
    %26 = vector.load %arg6[%c2_26, %c0_27, %c0_28] : memref<10x18x4xbf16, #tpu.memory_space<vmem>>, vector<8x16x4xbf16>
    %27 = vector.shape_cast %26 : vector<8x16x4xbf16> to vector<128x4xbf16>
    %c2_29 = arith.constant 2 : index
    %c1_30 = arith.constant 1 : index
    %c0_31 = arith.constant 0 : index
    %28 = vector.load %arg6[%c2_29, %c1_30, %c0_31] : memref<10x18x4xbf16, #tpu.memory_space<vmem>>, vector<8x16x4xbf16>
    %29 = vector.shape_cast %28 : vector<8x16x4xbf16> to vector<128x4xbf16>
    %c2_32 = arith.constant 2 : index
    %c2_33 = arith.constant 2 : index
    %c0_34 = arith.constant 0 : index
    %30 = vector.load %arg6[%c2_32, %c2_33, %c0_34] : memref<10x18x4xbf16, #tpu.memory_space<vmem>>, vector<8x16x4xbf16>
    %31 = vector.shape_cast %30 : vector<8x16x4xbf16> to vector<128x4xbf16>
    %32 = tpu.concatenate %15, %17, %19, %21, %23, %25, %27, %29, %31 in 1 : vector<128x4xbf16>, vector<128x4xbf16>, vector<128x4xbf16>, vector<128x4xbf16>, vector<128x4xbf16>, vector<128x4xbf16>, vector<128x4xbf16>, vector<128x4xbf16>, vector<128x4xbf16> -> vector<128x36xbf16>
    %c0_35 = arith.constant 0 : index
    %c0_36 = arith.constant 0 : index
    %33 = vector.load %arg3[%c0_35, %c0_36] : memref<36x4xbf16, #tpu.memory_space<vmem>>, vector<36x4xbf16>
    %cst_37 = arith.constant dense<0.000000e+00> : vector<128x4xf32>
    %34 = tpu.matmul %32, %33, %cst_37 {dimension_numbers = #tpu.dot_dimension_numbers<[1], [0], [0], [1], [0, 0, 1, 1], [], []>} : vector<128x36xbf16>, vector<36x4xbf16>, vector<128x4xf32> -> vector<128x4xf32>
    %c0_38 = arith.constant 0 : index
    %c0_39 = arith.constant 0 : index
    %35 = vector.load %arg4[%c0_38, %c0_39] : memref<1x4xf32, #tpu.memory_space<vmem>>, vector<1x4xf32>
    %36 = vector.shape_cast %35 : vector<1x4xf32> to vector<4xf32>
    %37 = vector.shape_cast %36 : vector<4xf32> to vector<1x4xf32>
    %38 = vector.broadcast %37 : vector<1x4xf32> to vector<128x4xf32>
    %39 = arith.addf %34, %38 : vector<128x4xf32>
    %cst_40 = arith.constant 0.000000e+00 : f32
    %40 = vector.broadcast %cst_40 : f32 to vector<128x4xf32>
    %41 = arith.maximumf %39, %40 : vector<128x4xf32>
    %42 = vector.shape_cast %41 : vector<128x4xf32> to vector<8x16x4xf32>
    %43 = arith.truncf %42 : vector<8x16x4xf32> to vector<8x16x4xbf16>
    %c0_41 = arith.constant 0 : index
    %c0_42 = arith.constant 0 : index
    %c0_43 = arith.constant 0 : index
    %c0_44 = arith.constant 0 : index
    %44 = vector.load %arg5[%c0_41, %c0_42, %c0_43, %c0_44] : memref<1x8x16x4xbf16, #tpu.memory_space<vmem>>, vector<1x8x16x4xbf16>
    %45 = vector.shape_cast %44 : vector<1x8x16x4xbf16> to vector<8x16x4xbf16>
    %46 = vector.shape_cast %43 : vector<8x16x4xbf16> to vector<1x8x16x4xbf16>
    tpu.vector_store %arg5[%c0_41, %c0_42, %c0_43, %c0_44], %46 {strides = array<i32>} : memref<1x8x16x4xbf16, #tpu.memory_space<vmem>>, vector<1x8x16x4xbf16>,
    return
  }
  func.func @transform_0(%arg0: i32, %arg1: i32) -> (i32, i32, i32, i32) {
    %c0_i32 = arith.constant 0 : i32
    %c0_i32_0 = arith.constant 0 : i32
    %c0_i32_1 = arith.constant 0 : i32
    %c0_i32_2 = arith.constant 0 : i32
    return %arg0, %c0_i32, %c0_i32_0, %c0_i32_1 : i32, i32, i32, i32
  }
  func.func @transform_1(%arg0: i32, %arg1: i32) -> (i32, i32) {
    %c0_i32 = arith.constant 0 : i32
    %c0_i32_0 = arith.constant 0 : i32
    %c0_i32_1 = arith.constant 0 : i32
    return %c0_i32, %c0_i32_0 : i32, i32
  }
  func.func @transform_2(%arg0: i32, %arg1: i32) -> (i32, i32) {
    %c0_i32 = arith.constant 0 : i32
    %c0_i32_0 = arith.constant 0 : i32
    %c0_i32_1 = arith.constant 0 : i32
    return %c0_i32, %c0_i32_0 : i32, i32
  }
  func.func @transform_3(%arg0: i32, %arg1: i32) -> (i32, i32, i32, i32) {
    %c0_i32 = arith.constant 0 : i32
    %c0_i32_0 = arith.constant 0 : i32
    %c0_i32_1 = arith.constant 0 : i32
    return %arg0, %arg1, %c0_i32, %c0_i32_0 : i32, i32, i32, i32
  }
}

</mosaic_0001>

<bundles_post_ra>
// kernel: tpu_custom_call.1
= control target key start
LH: loop header
LB: loop body
LE: loop exit
PB: predicated region body
PF: predicated region fallthrough
CT: control target
= control target key end

     0   :  { %s2686_s12 = smov 0   ;;  %s2688_s13 = smov 0   ;;  %s3605_s0 = inlined_call_operand.vmem [shape: bf16[2,16,16,4], index: 0, kind: input, shape index: {}]   ;;  %s3606_s1 = inlined_call_operand.vmem [shape: bf16[36,4], index: 1, kind: input, shape index: {}]   ;;  %s3607_s2 = inlined_call_operand.vmem [shape: f32[1,4], index: 2, kind: input, shape index: {}]   ;;  %s3608_s3 = inlined_call_operand.vmem [shape: bf16[2,16,16,4], index: 3, kind: output, shape index: {}]  }
   0x1   :  { %s2690_s14 = smov 0   ;;  %s2692_s15 = smov 0  }
   0x2   :  { %s2694_s16 = smov 0  }
   0x3 LB: > { %s22_s17 = sadd.s32 1, %s2647_s14  ;;  %s25_s18 = sadd.s32 1, %s2651_s15  ;;  %s2655_s16 = sphi %s2694_s16, %s13_s16   ;;  %s2651_s15 = sphi %s2692_s15, %s3622_s15   ;;  %s2647_s14 = sphi %s2690_s14, %s3621_s14   ;;  %s2643_s13 = sphi %s2688_s13, %s3620_s13   ;;  %s2639_s12 = sphi %s2686_s12, %s3619_s12  }
   0x4   : > { %p23_p0 = scmp.ge.s32.totalorder %s22_s17, 2  ;;  %p2323_p1 = scmp.ge.s32.totalorder %s2655_s16, 1 }
   0x5   : > { %p151_p2 = scmp.lt.s32.totalorder %s2655_s16, 5 }
   0x6   : > { %s3624_s17 = smov (%p23_p0, %s22_s17), 0  ;;  %s3626_s18 = smov (!%p23_p0, %s25_s18), %s2651_s15 }
   0x7   : > { %p152_p3 = pnand %p2323_p1, %p151_p2  ;;  %p27_p4 = scmp.ge.s32.totalorder %s3626_s18, 2 }
   0x8   : > { %vm198_vm0 = vcmask (!%p152_p3), 27648   ;;  %vm201_vm1 = vcmask (!%p152_p3), 24576   ;;  %p180_p5 = scmp.lt.s32.totalorder (!%p152_p3), %s2643_s13, 1  ;;  %s2722_s19 = sshll.u32 (!%p152_p3), %s2639_s12, 3  ;;  %v2657_v0 = vmov (!%p152_p3), 0  }
   0x9   : > { %s3628_s18 = smov (%p27_p4, %s3626_s18), 0  ;;  %155 = sbr.rel (%p152_p3) target bundleno = 569 (0x239), region = 32 }
   0xa   : > { %203 = vst.msk [vmem:[#allocation2 + $0xc] sm:$0xf] (!%p152_p3), %vm198_vm0, %v2657_v0  ;;  %199 = vst.msk [vmem:[#allocation2] sm:$0xf] (!%p152_p3), %vm198_vm0, %v2657_v0  ;;  %p188_p6 = scmp.lt.s32.totalorder (!%p152_p3), %s2722_s19, 15  ;;  %s2470_s20 = sshll.u32 (!%p152_p3), %s2639_s12, 6 }
   0xb   : > { %200 = vst.msk [vmem:[#allocation2 + $0x4] sm:$0xf] (!%p152_p3), %vm198_vm0, %v2657_v0  ;;  %204 = vst.msk [vmem:[#allocation2 + $0x10] sm:$0xf] (!%p152_p3), %vm198_vm0, %v2657_v0  ;;  %vm414_vm2 = vsmask.f32 (!%p152_p3), 7938 }
   0xc   : > { %206 = vst.msk [vmem:[#allocation2 + $0x18] sm:$0xf] (!%p152_p3), %vm198_vm0, %v2657_v0  ;;  %207 = vst.msk [vmem:[#allocation2 + $0x1c] sm:$0xf] (!%p152_p3), %vm198_vm0, %v2657_v0  ;;  %vm249_vm3 = vsmask.f32 (!%p152_p3), 256 }
   0xd   : > { %209 = vst.msk [vmem:[#allocation2 + $0x24] sm:$0xf] (!%p152_p3), %vm198_vm0, %v2657_v0  ;;  %210 = vst.msk [vmem:[#allocation2 + $0x28] sm:$0xf] (!%p152_p3), %vm198_vm0, %v2657_v0  ;;  %vm250_vm4 = vsmask.f32 (!%p152_p3), 4368 }
   0xe   : > { %212 = vst.msk [vmem:[#allocation2 + $0x30] sm:$0xf] (!%p152_p3), %vm198_vm0, %v2657_v0  ;;  %213 = vst.msk [vmem:[#allocation2 + $0x34] sm:$0xf] (!%p152_p3), %vm198_vm0, %v2657_v0  ;;  %p2333_p7 = scmp.le.s32.totalorder (!%p152_p3), %s2639_s12, 0 }
   0xf   : > { %215 = vst.msk [vmem:[#allocation2 + $0x3c] sm:$0xf] (!%p152_p3), %vm198_vm0, %v2657_v0  ;;  %216 = vst.msk [vmem:[#allocation2 + $0x40] sm:$0xf] (!%p152_p3), %vm198_vm0, %v2657_v0 }
  0x10   : > { %218 = vst.msk [vmem:[#allocation2 + $0x48] sm:$0xf] %vm198_vm0, %v2657_v0  ;;  %219 = vst.msk [vmem:[#allocation2 + $0x4c] sm:$0xf] %vm198_vm0, %v2657_v0  ;;  %s3630_s13 = smov (!%p180_p5, %s2643_s13), 1  ;;  %s2334_s7 = sadd.s32 (!%p2333_p7), 4294967295, %s2722_s19 }
  0x11   : > { %221 = vst.msk [vmem:[#allocation2 + $0x54] sm:$0xf] %vm198_vm0, %v2657_v0  ;;  %222 = vst.msk [vmem:[#allocation2 + $0x58] sm:$0xf] %vm198_vm0, %v2657_v0  ;;  %s189_s21 = scalar_select %p188_p6, %s2722_s19, 15 }
  0x12   : > { %224 = vst.msk [vmem:[#allocation2 + $0x60] sm:$0xf] %vm198_vm0, %v2657_v0  ;;  %225 = vst.msk [vmem:[#allocation2 + $0x64] sm:$0xf] %vm198_vm0, %v2657_v0  ;;  %s2468_s22 = sshll.u32 %s3630_s13, 7  ;;  %s2328_s23 = sshll.u32 %s3630_s13, 5 }
  0x13   : > { %227 = vst.msk [vmem:[#allocation2 + $0x6c] sm:$0xf] %vm198_vm0, %v2657_v0  ;;  %228 = vst.msk [vmem:[#allocation2 + $0x70] sm:$0xf] %vm198_vm0, %v2657_v0  ;;  %s2763_s26 = scalar_lea.vmem %s3605_s0, %s2468_s22  ;;  %s2327_s27 = sshll.u32 %s189_s21, 1 }
  0x14   : > { %205 = vst.msk [vmem:[#allocation2 + $0x14] sm:$0x1] %vm201_vm1, %v2657_v0  ;;  %202 = vst.msk [vmem:[#allocation2 + $0x8] sm:$0x1] %vm201_vm1, %v2657_v0  ;;  %s192_s28 = sadd.s32 %s2328_s23, %s2327_s27  ;;  %s2766_s29 = scalar_lea.vmem %s2763_s26, %s2470_s20  ;;  %v416_v8 = vld [vmem:[#allocation2 + $0xc] sm:$0xf] }
  0x15   : > { %208 = vst.msk [vmem:[#allocation2 + $0x20] sm:$0x1] %vm201_vm1, %v2657_v0  ;;  %211 = vst.msk [vmem:[#allocation2 + $0x2c] sm:$0x1] %vm201_vm1, %v2657_v0  ;;  %s2329_s30 = sshll.u32 %s192_s28, 2  ;;  %s2471_s8 = sshll.u32 (!%p2333_p7), %s2334_s7, 3 }
  0x16   : > { %214 = vst.msk [vmem:[#allocation2 + $0x38] sm:$0x1] %vm201_vm1, %v2657_v0  ;;  %217 = vst.msk [vmem:[#allocation2 + $0x44] sm:$0x1] %vm201_vm1, %v2657_v0  ;;  %v233_v1 = vld [vmem:[%s2766_s29] sm:$0xf]  ;;  %s2773_s6 = scalar_lea.vmem %s3608_s3, %s2329_s30  ;;  %s481_s9 = scalar_lea.vmem (!%p2333_p7), %s2763_s26, %s2471_s8 }
  0x17   : > { %220 = vst.msk [vmem:[#allocation2 + $0x50] sm:$0x1] %vm201_vm1, %v2657_v0  ;;  %223 = vst.msk [vmem:[#allocation2 + $0x5c] sm:$0x1] %vm201_vm1, %v2657_v0  ;;  %v234_v2 = vld [vmem:[%s2766_s29 + $0x4] sm:$0xf] }
  0x18   : > { %226 = vst.msk [vmem:[#allocation2 + $0x68] sm:$0x1] %vm201_vm1, %v2657_v0  ;;  %229 = vst.msk [vmem:[#allocation2 + $0x74] sm:$0x1] %vm201_vm1, %v2657_v0  ;;  %v253_v3 = vshrl.u32 %v233_v1, 16  ;;  %v256_v4 = vshll.u32 %v233_v1, 16 }
  0x19   : > { %vm2776_vm5 = vmand %vm198_vm0, %vm414_vm2  ;;  %v261_v6 = vshrl.u32 %v234_v2, 16  ;;  %v264_v7 = vshll.u32 %v234_v2, 16  ;;  %v235_v10 = vld [vmem:[%s2766_s29 + $0x8] sm:$0xf]  ;;  %v236_v15 = vld [vmem:[%s2766_s29 + $0xc] sm:$0xf] }
  0x1a   : > { %v255_v11 = vrot.slane %v253_v3, 7  ;;  %vm2782_vm6 = vmor %vm249_vm3, %vm250_vm4  ;;  %v270_v14 = vshrl.u32 %v235_v10, 16  ;;  %v273_v17 = vshll.u32 %v235_v10, 16  ;;  %v278_v18 = vshrl.u32 %v236_v15, 16  ;;  %v237_v20 = vld [vmem:[%s2766_s29 + $0x10] sm:$0xf] }
  0x1b   : > { %v422_v9 = vld [vmem:[#allocation2 + $0x14] sm:$0x1]  ;;  %v263_v13 = vrot.slane %v261_v6, 7  ;;  %vm2789_vm7 = vmand %vm201_vm1, %vm249_vm3  ;;  %v281_v19 = vshll.u32 %v236_v15, 16  ;;  %v425_v27 = vld [vmem:[#allocation2 + $0x18] sm:$0xf] }
  0x1c   : > { %v258_v21 = vor.u32 %v256_v4, %v255_v11  ;;  %v259_v22 = vrot.slane %v255_v11, 4  ;;  %v238_v25 = vld [vmem:[%s2766_s29 + $0x14] sm:$0xf]  ;;  %v272_v26 = vrot.slane %v270_v14, 7  ;;  %v280_v28 = vrot.slane %v278_v18, 7 }
  0x1d   : > { %v266_v23 = vor.u32 %v264_v7, %v263_v13  ;;  %v268_v24 = vrot.slane %v263_v13, 4  ;;  %v287_v29 = vshrl.u32 %v237_v20, 16  ;;  %v290_v30 = vshll.u32 %v237_v20, 16  ;;  %v429_v34 = vld [vmem:[#allocation2 + $0x20] sm:$0x1] }
  0x1e   : > { %v417_v31 = vsel %vm2776_vm5, %v258_v21, %v416_v8  ;;  %v295_v35 = vshrl.u32 %v238_v25, 16  ;;  %v239_v36 = vld [vmem:[%s2766_s29 + $0x18] sm:$0xf]  ;;  %v275_v37 = vor.u32 %v273_v17, %v272_v26  ;;  %v276_v38 = vrot.slane %v272_v26, 4  ;;  %v240_v41 = vld [vmem:[%s2766_s29 + $0x1c] sm:$0xf] }
  0x1f   : > { %v267_v32 = vsel %vm2782_vm6, %v259_v22, %v266_v23  ;;  %v423_v33 = vsel %vm2789_vm7, %v268_v24, %v422_v9  ;;  %418 = vst [vmem:[#allocation2 + $0xc] sm:$0xf] %v417_v31  ;;  %v283_v39 = vor.u32 %v281_v19, %v280_v28  ;;  %v285_v40 = vrot.slane %v280_v28, 4  ;;  %v241_v46 = vld [vmem:[%s2766_s29 + $0x20] sm:$0xf] }
  0x20   : > { %419 = vst.msk [vmem:[#allocation2 + $0x10] sm:$0xf] %vm198_vm0, %v267_v32  ;;  %424 = vst [vmem:[#allocation2 + $0x14] sm:$0x1] %v423_v33  ;;  %v289_v42 = vrot.slane %v287_v29, 7  ;;  %v297_v43 = vrot.slane %v295_v35, 7  ;;  %v426_v47 = vsel %vm2776_vm5, %v275_v37, %v425_v27 }
  0x21   : > { %v298_v44 = vshll.u32 %v238_v25, 16  ;;  %v304_v45 = vshrl.u32 %v239_v36, 16  ;;  %v284_v48 = vsel %vm2782_vm6, %v276_v38, %v283_v39  ;;  %v430_v49 = vsel %vm2789_vm7, %v285_v40, %v429_v34  ;;  %v432_v50 = vld [vmem:[#allocation2 + $0x24] sm:$0xf]  ;;  %v436_v51 = vld [vmem:[#allocation2 + $0x2c] sm:$0x1] }
  0x22   : > { %v307_v52 = vshll.u32 %v239_v36, 16  ;;  %427 = vst [vmem:[#allocation2 + $0x18] sm:$0xf] %v426_v47  ;;  %428 = vst.msk [vmem:[#allocation2 + $0x1c] sm:$0xf] %vm198_vm0, %v284_v48  ;;  %v292_v53 = vor.u32 %v290_v30, %v289_v42  ;;  %v293_v54 = vrot.slane %v289_v42, 4 }
  0x23   : > { %431 = vst [vmem:[#allocation2 + $0x20] sm:$0x1] %v430_v49  ;;  %v300_v55 = vor.u32 %v298_v44, %v297_v43  ;;  %v302_v56 = vrot.slane %v297_v43, 4  ;;  %v242_v57 = vld [vmem:[%s2766_s29 + $0x24] sm:$0xf]  ;;  %v306_v58 = vrot.slane %v304_v45, 7 }
  0x24   : > { %v312_v59 = vshrl.u32 %v240_v41, 16  ;;  %v315_v60 = vshll.u32 %v240_v41, 16  ;;  %v321_v61 = vshrl.u32 %v241_v46, 16  ;;  %v243_v62 = vld [vmem:[%s2766_s29 + $0x28] sm:$0xf]  ;;  %v433_v63 = vsel %vm2776_vm5, %v292_v53, %v432_v50 }
  0x25   : > { %v301_v0 = vsel %vm2782_vm6, %v293_v54, %v300_v55  ;;  %v437_v1 = vsel %vm2789_vm7, %v302_v56, %v436_v51  ;;  %v439_v2 = vld [vmem:[#allocation2 + $0x30] sm:$0xf]  ;;  %v443_v3 = vld [vmem:[#allocation2 + $0x38] sm:$0x1]  ;;  %v324_v4 = vshll.u32 %v241_v46, 16  ;;  %v309_v6 = vor.u32 %v307_v52, %v306_v58 }
  0x26   : > { %434 = vst [vmem:[#allocation2 + $0x24] sm:$0xf] %v433_v63  ;;  %435 = vst.msk [vmem:[#allocation2 + $0x28] sm:$0xf] %vm198_vm0, %v301_v0  ;;  %v310_v7 = vrot.slane %v306_v58, 4  ;;  %v314_v8 = vrot.slane %v312_v59, 7 }
  0x27   : > { %438 = vst [vmem:[#allocation2 + $0x2c] sm:$0x1] %v437_v1  ;;  %v323_v9 = vrot.slane %v321_v61, 7  ;;  %v244_v10 = vld [vmem:[%s2766_s29 + $0x2c] sm:$0xf]  ;;  %v329_v13 = vshrl.u32 %v242_v57, 16  ;;  %v440_v18 = vsel %vm2776_vm5, %v309_v6, %v439_v2 }
  0x28   : > { %v446_v11 = vld [vmem:[#allocation2 + $0x3c] sm:$0xf]  ;;  %v332_v14 = vshll.u32 %v242_v57, 16  ;;  %v338_v15 = vshrl.u32 %v243_v62, 16  ;;  %v341_v17 = vshll.u32 %v243_v62, 16  ;;  %v317_v19 = vor.u32 %v315_v60, %v314_v8 }
  0x29   : > { %v319_v20 = vrot.slane %v314_v8, 4  ;;  %v326_v21 = vor.u32 %v324_v4, %v323_v9  ;;  %v245_v22 = vld [vmem:[%s2766_s29 + $0x30] sm:$0xf]  ;;  %441 = vst [vmem:[#allocation2 + $0x30] sm:$0xf] %v440_v18  ;;  %v327_v23 = vrot.slane %v323_v9, 4 }
  0x2a   : > { %v331_v24 = vrot.slane %v329_v13, 7  ;;  %v340_v25 = vrot.slane %v338_v15, 7  ;;  %v346_v26 = vshrl.u32 %v244_v10, 16  ;;  %v246_v27 = vld [vmem:[%s2766_s29 + $0x34] sm:$0xf]  ;;  %v318_v28 = vsel %vm2782_vm6, %v310_v7, %v317_v19 }
  0x2b   : > { %v444_v29 = vsel %vm2789_vm7, %v319_v20, %v443_v3  ;;  %v447_v30 = vsel %vm2776_vm5, %v326_v21, %v446_v11  ;;  %v450_v31 = vld [vmem:[#allocation2 + $0x44] sm:$0x1]  ;;  %v453_v32 = vld [vmem:[#allocation2 + $0x48] sm:$0xf]  ;;  %v349_v33 = vshll.u32 %v244_v10, 16  ;;  %v355_v40 = vshrl.u32 %v245_v22, 16 }
  0x2c   : > { %442 = vst.msk [vmem:[#allocation2 + $0x34] sm:$0xf] %vm198_vm0, %v318_v28  ;;  %445 = vst [vmem:[#allocation2 + $0x38] sm:$0x1] %v444_v29  ;;  %v334_v34 = vor.u32 %v332_v14, %v331_v24  ;;  %v336_v35 = vrot.slane %v331_v24, 4  ;;  %v343_v36 = vor.u32 %v341_v17, %v340_v25  ;;  %v344_v37 = vrot.slane %v340_v25, 4 }
  0x2d   : > { %448 = vst [vmem:[#allocation2 + $0x3c] sm:$0xf] %v447_v30  ;;  %v247_v38 = vld [vmem:[%s2766_s29 + $0x38] sm:$0xf]  ;;  %v348_v39 = vrot.slane %v346_v26, 7  ;;  %v358_v41 = vshll.u32 %v245_v22, 16 }
  0x2e   : > { %v363_v42 = vshrl.u32 %v246_v27, 16  ;;  %v248_v43 = vld [vmem:[%s2766_s29 + $0x3c] sm:$0xf]  ;;  %v335_v44 = vsel %vm2782_vm6, %v327_v23, %v334_v34  ;;  %v451_v45 = vsel %vm2789_vm7, %v336_v35, %v450_v31  ;;  %v454_v46 = vsel %vm2776_vm5, %v343_v36, %v453_v32  ;;  %v457_v47 = vld [vmem:[#allocation2 + $0x50] sm:$0x1] }
  0x2f   : > { %v366_v48 = vshll.u32 %v246_v27, 16  ;;  %449 = vst.msk [vmem:[#allocation2 + $0x40] sm:$0xf] %vm198_vm0, %v335_v44  ;;  %452 = vst [vmem:[#allocation2 + $0x44] sm:$0x1] %v451_v45  ;;  %v351_v49 = vor.u32 %v349_v33, %v348_v39  ;;  %v353_v50 = vrot.slane %v348_v39, 4 }
  0x30   : > { %455 = vst [vmem:[#allocation2 + $0x48] sm:$0xf] %v454_v46  ;;  %v357_v51 = vrot.slane %v355_v40, 7  ;;  %v365_v52 = vrot.slane %v363_v42, 7  ;;  %v460_v53 = vld [vmem:[#allocation2 + $0x54] sm:$0xf] }
  0x31   : > { %v372_v54 = vshrl.u32 %v247_v38, 16  ;;  %v375_v55 = vshll.u32 %v247_v38, 16  ;;  %v380_v56 = vshrl.u32 %v248_v43, 16  ;;  %v383_v57 = vshll.u32 %v248_v43, 16  ;;  %v464_v62 = vld [vmem:[#allocation2 + $0x5c] sm:$0x1] }
  0x32   : > { %v352_v58 = vsel %vm2782_vm6, %v344_v37, %v351_v49  ;;  %v458_v59 = vsel %vm2789_vm7, %v353_v50, %v457_v47  ;;  %v360_v60 = vor.u32 %v358_v41, %v357_v51  ;;  %v361_v61 = vrot.slane %v357_v51, 4  ;;  %v467_v4 = vld [vmem:[#allocation2 + $0x60] sm:$0xf]  ;;  %v471_v10 = vld [vmem:[#allocation2 + $0x68] sm:$0x1] }
  0x33   : > { %456 = vst.msk [vmem:[#allocation2 + $0x4c] sm:$0xf] %vm198_vm0, %v352_v58  ;;  %459 = vst [vmem:[#allocation2 + $0x50] sm:$0x1] %v458_v59  ;;  %v368_v63 = vor.u32 %v366_v48, %v365_v52  ;;  %v370_v0 = vrot.slane %v365_v52, 4  ;;  %v374_v1 = vrot.slane %v372_v54, 7 }
  0x34   : > { %v382_v2 = vrot.slane %v380_v56, 7  ;;  %v461_v3 = vsel %vm2776_vm5, %v360_v60, %v460_v53  ;;  %477 = sbr.rel (%p2333_p7) target bundleno = 63 (0x3f), region = 36  ;;  %v482_v18 = vld [vmem:[%s481_s9] sm:$0xf] (!%p2333_p7)  ;;  %v483_v19 = vld [vmem:[%s481_s9 + $0x4] sm:$0xf] (!%p2333_p7) }
  0x35   : > { %462 = vst [vmem:[#allocation2 + $0x54] sm:$0xf] %v461_v3  ;;  %v369_v6 = vsel %vm2782_vm6, %v361_v61, %v368_v63  ;;  %v465_v7 = vsel %vm2789_vm7, %v370_v0, %v464_v62  ;;  %v377_v8 = vor.u32 %v375_v55, %v374_v1  ;;  %v378_v9 = vrot.slane %v374_v1, 4  ;;  %v504_v26 = vld [vmem:[#allocation2] sm:$0xf] (!%p2333_p7) }
  0x36   : > { %463 = vst.msk [vmem:[#allocation2 + $0x58] sm:$0xf] %vm198_vm0, %v369_v6  ;;  %466 = vst [vmem:[#allocation2 + $0x5c] sm:$0x1] %v465_v7  ;;  %v385_v11 = vor.u32 %v383_v57, %v382_v2  ;;  %v387_v13 = vrot.slane %v382_v2, 4  ;;  %v485_v20 = vshrl.u32 (!%p2333_p7), %v482_v18, 16 }
  0x37   : > { %v468_v14 = vsel %vm2776_vm5, %v377_v8, %v467_v4  ;;  %v488_v21 = vshll.u32 (!%p2333_p7), %v482_v18, 16  ;;  %v493_v22 = vshrl.u32 (!%p2333_p7), %v483_v19, 16  ;;  %v496_v23 = vshll.u32 (!%p2333_p7), %v483_v19, 16  ;;  %v508_v27 = vld [vmem:[#allocation2 + $0x8] sm:$0x1] (!%p2333_p7) }
  0x38   : > { %469 = vst [vmem:[#allocation2 + $0x60] sm:$0xf] %v468_v14  ;;  %v386_v15 = vsel %vm2782_vm6, %v378_v9, %v385_v11  ;;  %v472_v17 = vsel %vm2789_vm7, %v387_v13, %v471_v10  ;;  %v487_v24 = vrot.slane (!%p2333_p7), %v485_v20, 7 }
  0x39   : > { %470 = vst.msk [vmem:[#allocation2 + $0x64] sm:$0xf] %vm198_vm0, %v386_v15  ;;  %473 = vst [vmem:[#allocation2 + $0x68] sm:$0x1] %v472_v17  ;;  %v495_v25 = vrot.slane (!%p2333_p7), %v493_v22, 7 }
  0x3a   : > { %v490_v28 = vor.u32 (!%p2333_p7), %v488_v21, %v487_v24  ;;  %v491_v29 = vrot.slane (!%p2333_p7), %v487_v24, 4 }
  0x3b   : > { %v498_v30 = vor.u32 %v496_v23, %v495_v25  ;;  %v500_v31 = vrot.slane %v495_v25, 4 }
  0x3c   : > { %v505_v32 = vsel %vm2776_vm5, %v490_v28, %v504_v26 }
  0x3d   : > { %v499_v33 = vsel %vm2782_vm6, %v491_v29, %v498_v30  ;;  %v509_v34 = vsel %vm2789_vm7, %v500_v31, %v508_v27  ;;  %506 = vst [vmem:[#allocation2] sm:$0xf] %v505_v32 }
  0x3e   : > { %507 = vst.msk [vmem:[#allocation2 + $0x4] sm:$0xf] %vm198_vm0, %v499_v33  ;;  %510 = vst [vmem:[#allocation2 + $0x8] sm:$0x1] %v509_v34 }
  0x3f PF: > { %p2337_p8 = scmp.ge.s32.totalorder %s2639_s12, 1 }
  0x40   : > { %v2340_v35 = vld [vmem:[%s2766_s29 + $0x40] sm:$0xf] (!%p2337_p8)  ;;  %v2341_v36 = vld [vmem:[%s2766_s29 + $0x44] sm:$0xf] (!%p2337_p8)  ;;  %v542_v43 = vld [vmem:[#allocation2 + $0x6c] sm:$0xf] (!%p2337_p8) }
  0x41   : > { %514 = sbr.rel (%p2337_p8) target bundleno = 74 (0x4a), region = 40  ;;  %v522_v37 = vshrl.u32 (!%p2337_p8), %v2340_v35, 16  ;;  %v525_v38 = vshll.u32 (!%p2337_p8), %v2340_v35, 16  ;;  %v530_v39 = vshrl.u32 (!%p2337_p8), %v2341_v36, 16  ;;  %v533_v40 = vshll.u32 (!%p2337_p8), %v2341_v36, 16 }
  0x42   : > { %v546_v44 = vld [vmem:[#allocation2 + $0x74] sm:$0x1] (!%p2337_p8) }
  0x43   : > { %v524_v41 = vrot.slane (!%p2337_p8), %v522_v37, 7  ;;  %v532_v42 = vrot.slane (!%p2337_p8), %v530_v39, 7 }
  0x45   : > { %v527_v45 = vor.u32 (!%p2337_p8), %v525_v38, %v524_v41  ;;  %v528_v46 = vrot.slane (!%p2337_p8), %v524_v41, 4  ;;  %v535_v47 = vor.u32 (!%p2337_p8), %v533_v40, %v532_v42  ;;  %v537_v48 = vrot.slane (!%p2337_p8), %v532_v42, 4 }
  0x47   : > { %v543_v49 = vsel (!%p2337_p8), %vm2776_vm5, %v527_v45, %v542_v43  ;;  %v536_v50 = vsel (!%p2337_p8), %vm2782_vm6, %v528_v46, %v535_v47  ;;  %v547_v51 = vsel (!%p2337_p8), %vm2789_vm7, %v537_v48, %v546_v44 }
  0x48   : > { %544 = vst [vmem:[#allocation2 + $0x6c] sm:$0xf] %v543_v49  ;;  %545 = vst.msk [vmem:[#allocation2 + $0x70] sm:$0xf] %vm198_vm0, %v536_v50 }
  0x49   : > { %548 = vst [vmem:[#allocation2 + $0x74] sm:$0x1] %v547_v51 }
  0x4a PF: > { %v2881_v52 = vld [vmem:[#allocation2 + $0x34] sm:$0xf]  ;;  %v2883_v53 = vld [vmem:[#allocation2 + $0x38] sm:$0x1]  ;;  %v772_v54 = vld [vmem:[#allocation2 + $0x30] sm:$0xe] }
  0x4b   : > { %v692_v55 = vshll.u32 %v2883_v53, 16  ;;  %vm800_vm8 = vcmask 1042432   ;;  %vm801_vm9 = vcmask 1046532   ;;  %v2346_v5 = vrot.slane %v772_v54, 9  ;;  %v550_v57 = vld [vmem:[#allocation2 + $0x4] sm:$0xf] }
  0x4c   : > { %vm2886_vm10 = vmor %vm800_vm8, %vm801_vm9  ;;  %v833_v16 = vrot.slane %v2881_v52, 5  ;;  %v836_v56 = vrot.slane %v2883_v53, 5  ;;  %v565_v58 = vld [vmem:[#allocation2 + $0x8] sm:$0x1]  ;;  %v768_v60 = vld [vmem:[#allocation2] sm:$0xe] }
  0x4d   : > { %v596_v59 = vshll.u32 %v565_v58, 16  ;;  %v805_v61 = vrot.slane %v550_v57, 5  ;;  %v808_v62 = vrot.slane %v565_v58, 5  ;;  %v586_v63 = vshll.u32 %v550_v57, 16  ;;  %v2894_v3 = vld [vmem:[#allocation2 + $0x40] sm:$0xf] }
  0x4e   : > { %v834_v0 = vsel %vm2886_vm10, %v2346_v5, %v833_v16  ;;  %v835_v1 = vrot.slane %v833_v16, 4  ;;  %v2342_v2 = vrot.slane %v768_v60, 9  ;;  %v2896_v4 = vld [vmem:[#allocation2 + $0x44] sm:$0x1]  ;;  %v773_v7 = vld [vmem:[#allocation2 + $0x3c] sm:$0xe] }
  0x4f   : > { %v807_v6 = vrot.slane %v805_v61, 4  ;;  %v840_v8 = vrot.slane %v2894_v3, 5  ;;  %v843_v9 = vrot.slane %v2896_v4, 5  ;;  %v2900_v10 = vrot.slane %v586_v63, 5  ;;  %v552_v15 = vld [vmem:[#allocation2 + $0x10] sm:$0xf] }
  0x50   : > { %v837_v11 = vsel %vm2886_vm10, %v835_v1, %v836_v56  ;;  %v806_v13 = vsel %vm2886_vm10, %v2342_v2, %v805_v61  ;;  %v2347_v14 = vrot.slane %v773_v7, 9  ;;  %v566_v17 = vld [vmem:[#allocation2 + $0x14] sm:$0x1]  ;;  %v590_v18 = vshrl.u32 %v550_v57, 16  ;;  %v769_v22 = vld [vmem:[#allocation2 + $0xc] sm:$0xe] }
  0x51   : > { %v2386_v19 = vcombine.low %v834_v0, %v837_v11  ;;  %v809_v20 = vsel %vm2886_vm10, %v807_v6, %v808_v62  ;;  %v842_v21 = vrot.slane %v840_v8, 4  ;;  %v812_v23 = vrot.slane %v552_v15, 5  ;;  %v551_v24 = vld [vmem:[#allocation2 + $0xc] sm:$0xf]  ;;  %v549_v29 = vld [vmem:[#allocation2] sm:$0xf] }
  0x52   : > { %v2382_v25 = vcombine.low %v806_v13, %v809_v20  ;;  %v841_v26 = vsel %vm2886_vm10, %v2347_v14, %v840_v8  ;;  %v2343_v27 = vrot.slane %v769_v22, 9  ;;  %v815_v28 = vrot.slane %v566_v17, 5  ;;  %s2658_s10 = smov 8   ;;  %v559_v44 = vld [vmem:[#allocation2 + $0x3c] sm:$0xf]  ;;  %s2659_s11 = smov 4  }
  0x53   : > { %1572 = vrot.lane.b32.xlu1 %v2386_v19, %s2658_s10  ;;  %v844_v30 = vsel %vm2886_vm10, %v842_v21, %v843_v9  ;;  %v814_v31 = vrot.slane %v812_v23, 4  ;;  %vm573_vm11 = vsmask.f32 3328  ;;  %vm574_vm12 = vsmask.f32 7440  ;;  %s2660_s12 = smov 12  }
  0x54   : > { %1564 = vrot.lane.b32.xlu0 %v2382_v25, %s2658_s10  ;;  %v2387_v32 = vcombine.low %v841_v26, %v844_v30  ;;  %v813_v33 = vsel %vm2886_vm10, %v2343_v27, %v812_v23  ;;  %v601_v34 = vshrl.u32 %v551_v24, 16  ;;  %v604_v35 = vshll.u32 %v551_v24, 16  ;;  %vm2922_vm13 = vmor %vm573_vm11, %vm574_vm12  ;;  %v557_v6 = vld [vmem:[#allocation2 + $0x30] sm:$0xf]  ;;  %v867_v25 = vld [vmem:[#allocation2 + $0x3c] sm:$0xf] }
  0x55   : > { %v816_v36 = vsel %vm2886_vm10, %v814_v31, %v815_v28  ;;  %v610_v37 = vshll.u32 %v552_v15, 16  ;;  %v614_v38 = vshrl.u32 %v552_v15, 16  ;;  %v620_v39 = vshll.u32 %v566_v17, 16  ;;  %s2661_s13 = smov 16   ;;  %s2662_s19 = smov 20  }
  0x56   : > { %v2383_v40 = vcombine.low %v813_v33, %v816_v36  ;;  %v603_v41 = vrot.slane %v601_v34, 4  ;;  %v606_v42 = vrot.slane %v604_v35, 5  ;;  %v577_v43 = vshrl.u32 %v549_v29, 16  ;;  %v2948_v33 = vld [vmem:[#allocation2 + $0xc] sm:$0xf]  ;;  %s2663_s20 = smov 24  }
  0x57   : > { %1574 = vrot.lane.b32.xlu1 %v2387_v32, %s2658_s10  ;;  %v612_v45 = vrot.slane %v610_v37, 5  ;;  %v616_v46 = vrot.slane %v614_v38, 4  ;;  %v622_v47 = vrot.slane %v620_v39, 5  ;;  %v580_v48 = vshll.u32 %v549_v29, 16  ;;  %v2941_v29 = vld [vmem:[#allocation2 + $0x40] sm:$0xf] }
  0x58   : > { %1566 = vrot.lane.b32.xlu0 %v2383_v40, %s2658_s10  ;;  %v607_v49 = vor.u32 %v606_v42, %v603_v41  ;;  %v579_v50 = vrot.slane %v577_v43, 4  ;;  %v592_v51 = vrot.slane %v590_v18, 4  ;;  %v598_v54 = vrot.slane %v596_v59, 5  ;;  %v2953_v38 = vld [vmem:[#allocation2 + $0x10] sm:$0xf]  ;;  %s2664_s25 = smov 28  }
  0x59   : > { %v617_v16 = vor.u32 %v616_v46, %v612_v45  ;;  %v582_v56 = vrot.slane %v580_v48, 5  ;;  %v697_v57 = vshrl.u32 %v559_v44, 16  ;;  %v700_v58 = vshll.u32 %v559_v44, 16  ;;  %v869_v42 = vld [vmem:[#allocation2 + $0x48] sm:$0xf]  ;;  %s2665_s26 = smov 32  }
  0x5a   : > { %v608_v60 = vrot.slane %v607_v49, 4  ;;  %v593_v61 = vor.u32 %v592_v51, %v2900_v10  ;;  %v706_v62 = vshll.u32 %v2894_v3, 16  ;;  %v710_v63 = vshrl.u32 %v2894_v3, 16 }
  0x5b   : > { %v618_v0 = vrot.slane %v617_v16, 4  ;;  %v583_v1 = vor.u32 %v582_v56, %v579_v50  ;;  %v699_v59 = vrot.slane %v697_v57, 4  ;;  %v702_v2 = vrot.slane %v700_v58, 5  ;;  %v2963_v50 = vld [vmem:[#allocation2 + $0x18] sm:$0xf] }
  0x5c   : > { %v613_v7 = vsel %vm2922_vm13, %v608_v60, %v612_v45  ;;  %v594_v8 = vrot.slane %v593_v61, 4  ;;  %v708_v9 = vrot.slane %v706_v62, 5  ;;  %v712_v11 = vrot.slane %v710_v63, 4  ;;  %v2958_v45 = vld [vmem:[#allocation2 + $0x4c] sm:$0xf] }
  0x5d   : > { %v623_v13 = vsel %vm2922_vm13, %v618_v0, %v622_v47  ;;  %v584_v14 = vrot.slane %v583_v1, 4  ;;  %v703_v15 = vor.u32 %v702_v2, %v699_v59  ;;  %v716_v17 = vshll.u32 %v2896_v4, 16  ;;  %v2967_v57 = vld [vmem:[#allocation2 + $0x1c] sm:$0xf]  ;;  %v2974_v2 = vld [vmem:[#allocation2 + $0x44] sm:$0x1] }
  0x5e   : > { %v2375_v18 = vcombine.low %v613_v7, %v623_v13  ;;  %v599_v3 = vsel %vm2922_vm13, %v594_v8, %v598_v54  ;;  %v713_v19 = vor.u32 %v712_v11, %v708_v9  ;;  %v673_v20 = vshrl.u32 %v557_v6, 16 }
  0x5f   : > { %v589_v21 = vsel %vm2922_vm13, %v584_v14, %v2900_v10  ;;  %v704_v22 = vrot.slane %v703_v15, 4  ;;  %v718_v23 = vrot.slane %v716_v17, 5  ;;  %v676_v24 = vshll.u32 %v557_v6, 16  ;;  %v2984_v17 = vld [vmem:[#allocation2 + $0x14] sm:$0x1] }
  0x60   : > { %1526 = vrot.lane.b32.xlu1 %v2375_v18, %s2659_s11  ;;  %v2374_v26 = vcombine.low %v589_v21, %v599_v3  ;;  %v714_v27 = vrot.slane %v713_v19, 4  ;;  %v675_v4 = vrot.slane %v673_v20, 4  ;;  %v682_v28 = vshll.u32 %v2881_v52, 16 }
  0x61   : > { %v709_v30 = vsel %vm2922_vm13, %v704_v22, %v708_v9  ;;  %v678_v31 = vrot.slane %v676_v24, 5  ;;  %v686_v10 = vshrl.u32 %v2881_v52, 16  ;;  %v694_v32 = vrot.slane %v692_v55, 5 }
  0x62   : > { %1524 = vrot.lane.b32.xlu0 %v2374_v26, %s2659_s11  ;;  %v719_v34 = vsel %vm2922_vm13, %v714_v27, %v718_v23  ;;  %v684_v35 = vrot.slane %v682_v28, 5  ;;  %v980_v36 = vshrl.u32 %v867_v25, 16  ;;  %v983_v37 = vshll.u32 %v867_v25, 16 }
  0x63   : > { %v2379_v39 = vcombine.low %v709_v30, %v719_v34  ;;  %v679_v40 = vor.u32 %v678_v31, %v675_v4  ;;  %v688_v41 = vrot.slane %v686_v10, 4  ;;  %v993_v52 = vshrl.u32 %v2941_v29, 16 }
  0x64   : > { %v982_v53 = vrot.slane %v980_v36, 4  ;;  %v985_v55 = vrot.slane %v983_v37, 5  ;;  %v2394_v43 = vcombine.low %v867_v25, %v2941_v29  ;;  %v884_v44 = vshrl.u32 %v2948_v33, 16  ;;  %v2989_v25 = vld [vmem:[#allocation2 + $0x50] sm:$0x1] }
  0x65   : > { %1534 = vrot.lane.b32.xlu1 %v2379_v39, %s2659_s11  ;;  %v680_v46 = vrot.slane %v679_v40, 4  ;;  %v689_v47 = vor.u32 %v688_v41, %v684_v35  ;;  %v887_v48 = vshll.u32 %v2948_v33, 16  ;;  %v897_v49 = vshrl.u32 %v2953_v38, 16 }
  0x66   : > { %v886_v51 = vrot.slane %v884_v44, 4  ;;  %v2390_v54 = vcombine.low %v2948_v33, %v2953_v38  ;;  %v1004_v16 = vshrl.u32 %v869_v42, 16  ;;  %v1007_v56 = vshll.u32 %v869_v42, 16  ;;  %v1079_v44 = vld [vmem:[#allocation2 + $0x3c] sm:$0xe] }
  0x67   : > { %v685_v58 = vsel %vm2922_vm13, %v680_v46, %v684_v35  ;;  %v690_v60 = vrot.slane %v689_v47, 4  ;;  %v889_v61 = vrot.slane %v887_v48, 5  ;;  %v1017_v62 = vshrl.u32 %v2958_v45, 16 }
  0x68   : > { %v1006_v63 = vrot.slane %v1004_v16, 4  ;;  %v1009_v0 = vrot.slane %v1007_v56, 5  ;;  %v2395_v1 = vcombine.low %v869_v42, %v2958_v45  ;;  %v908_v59 = vshrl.u32 %v2963_v50, 16 }
  0x69   : > { %v695_v6 = vsel %vm2922_vm13, %v690_v60, %v694_v32  ;;  %1620 = vrot.lane.b32.xlu1 %v2394_v43, %s2660_s12  ;;  %v911_v7 = vshll.u32 %v2963_v50, 16  ;;  %v921_v8 = vshrl.u32 %v2967_v57, 16  ;;  %v2391_v9 = vcombine.low %v2963_v50, %v2967_v57 }
  0x6a   : > { %v2378_v11 = vcombine.low %v685_v58, %v695_v6  ;;  %v910_v13 = vrot.slane %v908_v59, 4  ;;  %v986_v14 = vor.u32 %v985_v55, %v982_v53  ;;  %v989_v15 = vshll.u32 %v2941_v29, 16  ;;  %v1080_v6 = vld [vmem:[#allocation2 + $0x48] sm:$0xe] }
  0x6b   : > { %v913_v18 = vrot.slane %v911_v7, 5  ;;  %v995_v3 = vrot.slane %v993_v52, 4  ;;  %v999_v19 = vshll.u32 %v2974_v2, 16  ;;  %v890_v20 = vor.u32 %v889_v61, %v886_v51  ;;  %v3000_v52 = vld [vmem:[#allocation2 + $0x20] sm:$0x1] }
  0x6c   : > { %1532 = vrot.lane.b32.xlu0 %v2378_v11, %s2659_s11  ;;  %v987_v21 = vrot.slane %v986_v14, 4  ;;  %v991_v22 = vrot.slane %v989_v15, 5  ;;  %v893_v23 = vshll.u32 %v2953_v38, 16  ;;  %v899_v24 = vrot.slane %v897_v49, 4 }
  0x6d   : > { %1622 = vrot.lane.b32.xlu1 %v2395_v1, %s2660_s12  ;;  %v1001_v26 = vrot.slane %v999_v19, 5  ;;  %v891_v27 = vrot.slane %v890_v20, 4  ;;  %v903_v4 = vshll.u32 %v2984_v17, 16  ;;  %v1010_v28 = vor.u32 %v1009_v0, %v1006_v63 }
  0x6e   : > { %v992_v30 = vsel %vm2922_vm13, %v987_v21, %v991_v22  ;;  %v996_v31 = vor.u32 %v995_v3, %v991_v22  ;;  %v895_v10 = vrot.slane %v893_v23, 5  ;;  %v1013_v32 = vshll.u32 %v2958_v45, 16  ;;  %v1076_v21 = vld [vmem:[#allocation2 + $0x18] sm:$0xe] }
  0x6f   : > { %v905_v33 = vrot.slane %v903_v4, 5  ;;  %v1011_v34 = vrot.slane %v1010_v28, 4  ;;  %v1019_v35 = vrot.slane %v1017_v62, 4  ;;  %v1023_v36 = vshll.u32 %v2989_v25, 16  ;;  %v1075_v62 = vld [vmem:[#allocation2 + $0xc] sm:$0xe] }
  0x70   : > { %1612 = vrot.lane.b32.xlu0 %v2390_v54, %s2660_s12  ;;  %v997_v37 = vrot.slane %v996_v31, 4  ;;  %v896_v39 = vsel %vm2922_vm13, %v891_v27, %v895_v10  ;;  %v900_v40 = vor.u32 %v899_v24, %v895_v10  ;;  %v1015_v41 = vrot.slane %v1013_v32, 5  ;;  %v1172_v24 = vld [vmem:[#allocation2 + $0x48] sm:$0xf]  ;;  %v3040_v32 = vld [vmem:[#allocation2 + $0x18] sm:$0xf] }
  0x71   : > { %v1025_v42 = vrot.slane %v1023_v36, 5  ;;  %v914_v53 = vor.u32 %v913_v18, %v910_v13  ;;  %v917_v55 = vshll.u32 %v2967_v57, 16  ;;  %v923_v43 = vrot.slane %v921_v8, 4  ;;  %v3045_v36 = vld [vmem:[#allocation2 + $0x1c] sm:$0xf] }
  0x72   : > { %v1002_v46 = vsel %vm2922_vm13, %v997_v37, %v1001_v26  ;;  %v901_v47 = vrot.slane %v900_v40, 4  ;;  %v1016_v48 = vsel %vm2922_vm13, %v1011_v34, %v1015_v41  ;;  %v1020_v49 = vor.u32 %v1019_v35, %v1015_v41  ;;  %v1174_v41 = vld [vmem:[#allocation2 + $0x54] sm:$0xf] }
  0x73   : > { %v2402_v50 = vcombine.low %v992_v30, %v1002_v46  ;;  %v915_v51 = vrot.slane %v914_v53, 4  ;;  %v919_v54 = vrot.slane %v917_v55, 5  ;;  %v927_v16 = vshll.u32 %v3000_v52, 16 }
  0x74   : > { %1614 = vrot.lane.b32.xlu0 %v2391_v9, %s2660_s12  ;;  %v906_v56 = vsel %vm2922_vm13, %v901_v47, %v905_v33  ;;  %v1021_v58 = vrot.slane %v1020_v49, 4  ;;  %v2354_v60 = vrot.slane %v1079_v44, 9  ;;  %v1137_v61 = vrot.slane %v2941_v29, 5  ;;  %v3055_v44 = vld [vmem:[#allocation2 + $0x24] sm:$0xf] }
  0x75   : > { %1660 = vrot.lane.b32.xlu1 %v2402_v50, %s2661_s13  ;;  %v2398_v63 = vcombine.low %v896_v39, %v906_v56  ;;  %v920_v0 = vsel %vm2922_vm13, %v915_v51, %v919_v54  ;;  %v924_v1 = vor.u32 %v923_v43, %v919_v54  ;;  %v929_v59 = vrot.slane %v927_v16, 5  ;;  %v3063_v50 = vld [vmem:[#allocation2 + $0x28] sm:$0xf] }
  0x76   : > { %v1026_v7 = vsel %vm2922_vm13, %v1021_v58, %v1025_v42  ;;  %v1138_v8 = vsel %vm2886_vm10, %v2354_v60, %v1137_v61  ;;  %v1139_v9 = vrot.slane %v1137_v61, 4  ;;  %v1140_v29 = vrot.slane %v2974_v2, 5 }
  0x77   : > { %v2403_v11 = vcombine.low %v1016_v48, %v1026_v7  ;;  %v925_v13 = vrot.slane %v924_v1, 4  ;;  %v2350_v14 = vrot.slane %v1075_v62, 9  ;;  %v1109_v15 = vrot.slane %v2953_v38, 5 }
  0x78   : > { %1652 = vrot.lane.b32.xlu0 %v2398_v63, %s2661_s13  ;;  %v1141_v18 = vsel %vm2886_vm10, %v1139_v9, %v1140_v29  ;;  %v1112_v3 = vrot.slane %v2984_v17, 5  ;;  %v2355_v19 = vrot.slane %v1080_v6, 9  ;;  %v1144_v20 = vrot.slane %v2958_v45, 5  ;;  %v3034_v45 = vld [vmem:[#allocation2 + $0x4c] sm:$0xf] }
  0x79   : > { %1662 = vrot.lane.b32.xlu1 %v2403_v11, %s2661_s13  ;;  %v930_v2 = vsel %vm2922_vm13, %v925_v13, %v929_v59  ;;  %v2410_v22 = vcombine.low %v1138_v8, %v1141_v18  ;;  %v1110_v38 = vsel %vm2886_vm10, %v2350_v14, %v1109_v15  ;;  %v1111_v23 = vrot.slane %v1109_v15, 4  ;;  %v3070_v63 = vld [vmem:[#allocation2 + $0x50] sm:$0x1]  ;;  %v3077_v11 = vld [vmem:[#allocation2 + $0x20] sm:$0x1] }
  0x7a   : > { %v2399_v26 = vcombine.low %v920_v0, %v930_v2  ;;  %v1145_v27 = vsel %vm2886_vm10, %v2355_v19, %v1144_v20  ;;  %v1146_v17 = vrot.slane %v1144_v20, 4  ;;  %v1147_v4 = vrot.slane %v2989_v25, 5  ;;  %v3083_v2 = vld [vmem:[#allocation2 + $0x5c] sm:$0x1] }
  0x7b   : > { %v1113_v28 = vsel %vm2886_vm10, %v1111_v23, %v1112_v3  ;;  %v2351_v30 = vrot.slane %v1076_v21, 9  ;;  %v1116_v31 = vrot.slane %v2967_v57, 5  ;;  %v1119_v10 = vrot.slane %v3000_v52, 5  ;;  %v3051_v52 = vld [vmem:[#allocation2 + $0x58] sm:$0xf] }
  0x7c   : > { %1654 = vrot.lane.b32.xlu0 %v2399_v26, %s2661_s13  ;;  %v2406_v33 = vcombine.low %v1110_v38, %v1113_v28  ;;  %v1148_v34 = vsel %vm2886_vm10, %v1146_v17, %v1147_v4  ;;  %v1285_v35 = vshrl.u32 %v1172_v24, 16  ;;  %v1288_v25 = vshll.u32 %v1172_v24, 16 }
  0x7d   : > { %1700 = vrot.lane.b32.xlu1 %v2410_v22, %s2662_s19  ;;  %v2411_v37 = vcombine.low %v1145_v27, %v1148_v34  ;;  %v1117_v57 = vsel %vm2886_vm10, %v2351_v30, %v1116_v31  ;;  %v1118_v39 = vrot.slane %v1116_v31, 4  ;;  %v1298_v40 = vshrl.u32 %v3034_v45, 16 }
  0x7e   : > { %v1287_v42 = vrot.slane %v1285_v35, 4  ;;  %v1290_v53 = vrot.slane %v1288_v25, 5  ;;  %v2418_v55 = vcombine.low %v1172_v24, %v3034_v45  ;;  %v1189_v43 = vshrl.u32 %v3040_v32, 16  ;;  %v3094_v25 = vld [vmem:[#allocation2 + $0x2c] sm:$0x1] }
  0x7f   : > { %v1120_v46 = vsel %vm2886_vm10, %v1118_v39, %v1119_v10  ;;  %v1192_v47 = vshll.u32 %v3040_v32, 16  ;;  %v1202_v48 = vshrl.u32 %v3045_v36, 16  ;;  %v2414_v49 = vcombine.low %v3040_v32, %v3045_v36 }
  0x80   : > { %1692 = vrot.lane.b32.xlu0 %v2406_v33, %s2662_s19  ;;  %v2407_v51 = vcombine.low %v1117_v57, %v1120_v46  ;;  %v1191_v54 = vrot.slane %v1189_v43, 4  ;;  %v1309_v16 = vshrl.u32 %v1174_v41, 16  ;;  %v1312_v56 = vshll.u32 %v1174_v41, 16  ;;  %v2600_v46 = vld [vmem:[%s3606_s1 + $0x8] sm:$0xff]  }
  0x81   : > { %1702 = vrot.lane.b32.xlu1 %v2411_v37, %s2662_s19  ;;  %v1194_v58 = vrot.slane %v1192_v47, 5  ;;  %v1322_v60 = vshrl.u32 %v3051_v52, 16  ;;  %v2419_v61 = vcombine.low %v1174_v41, %v3051_v52  ;;  %v1213_v62 = vshrl.u32 %v3055_v44, 16  ;;  %v1384_v41 = vld [vmem:[#allocation2 + $0x48] sm:$0xe] }
  0x82   : > { %v1311_v0 = vrot.slane %v1309_v16, 4  ;;  %v1314_v1 = vrot.slane %v1312_v56, 5  ;;  %v1216_v59 = vshll.u32 %v3055_v44, 16  ;;  %v1226_v6 = vshrl.u32 %v3063_v50, 16 }
  0x83   : > { %v1215_v7 = vrot.slane %v1213_v62, 4  ;;  %v2415_v8 = vcombine.low %v3055_v44, %v3063_v50  ;;  %v1291_v9 = vor.u32 %v1290_v53, %v1287_v42  ;;  %v1294_v29 = vshll.u32 %v3034_v45, 16  ;;  %v2599_v42 = vld [vmem:[%s3606_s1] sm:$0xff]  }
  0x84   : > { %1694 = vrot.lane.b32.xlu0 %v2407_v51, %s2662_s19  ;;  %v1218_v13 = vrot.slane %v1216_v59, 5  ;;  %v1300_v14 = vrot.slane %v1298_v40, 4  ;;  %v1304_v15 = vshll.u32 %v3070_v63, 16  ;;  %v1195_v18 = vor.u32 %v1194_v58, %v1191_v54  ;;  %2500 = vmatprep.subr.bf16.mxu0 %v2599_v42  ;;  %v561_v59 = vld [vmem:[#allocation2 + $0x48] sm:$0xf] }
  0x85   : > { %1748 = vrot.lane.b32.xlu1 %v2418_v55, %s2663_s20  ;;  %v1292_v3 = vrot.slane %v1291_v9, 4  ;;  %v1296_v19 = vrot.slane %v1294_v29, 5  ;;  %v1198_v20 = vshll.u32 %v3045_v36, 16  ;;  %v1204_v21 = vrot.slane %v1202_v48, 4  ;;  %2522 = vmatprep.subr.bf16.mxu1 %v2599_v42  ;;  %v3122_v29 = vld [vmem:[#allocation2 + $0x50] sm:$0x1] }
  0x86   : > { %v1306_v22 = vrot.slane %v1304_v15, 5  ;;  %v1196_v38 = vrot.slane %v1195_v18, 4  ;;  %v1208_v23 = vshll.u32 %v3077_v11, 16  ;;  %v1315_v24 = vor.u32 %v1314_v1, %v1311_v0  ;;  %2501 = vmatpush3.bf16.msra.mxu0 %v2599_v42  ;;  %2525 = vmatpush3.bf16.msra.mxu1 %v2599_v42 }
  0x87   : > { %v1297_v26 = vsel %vm2922_vm13, %v1292_v3, %v1296_v19  ;;  %v1301_v27 = vor.u32 %v1300_v14, %v1296_v19  ;;  %v1200_v17 = vrot.slane %v1198_v20, 5  ;;  %v1318_v4 = vshll.u32 %v3051_v52, 16  ;;  %2502 = vmatprep.subr.bf16.mxu0 %v2600_v46  ;;  %2523 = vmatprep.subr.bf16.mxu1 %v2600_v46 }
  0x88   : > { %1740 = vrot.lane.b32.xlu0 %v2414_v49, %s2663_s20  ;;  %v1210_v28 = vrot.slane %v1208_v23, 5  ;;  %v1316_v30 = vrot.slane %v1315_v24, 4  ;;  %v1324_v31 = vrot.slane %v1322_v60, 4  ;;  %v1328_v10 = vshll.u32 %v3083_v2, 16  ;;  %v1380_v60 = vld [vmem:[#allocation2 + $0x18] sm:$0xe] }
  0x89   : > { %1750 = vrot.lane.b32.xlu1 %v2419_v61, %s2663_s20  ;;  %v1302_v32 = vrot.slane %v1301_v27, 4  ;;  %v1201_v33 = vsel %vm2922_vm13, %v1196_v38, %v1200_v17  ;;  %v1205_v34 = vor.u32 %v1204_v21, %v1200_v17  ;;  %v1320_v35 = vrot.slane %v1318_v4, 5 }
  0x8a   : > { %v1330_v37 = vrot.slane %v1328_v10, 5  ;;  %v1219_v57 = vor.u32 %v1218_v13, %v1215_v7  ;;  %v1222_v39 = vshll.u32 %v3063_v50, 16  ;;  %v1228_v40 = vrot.slane %v1226_v6, 4  ;;  %v3115_v6 = vld [vmem:[#allocation2 + $0x4c] sm:$0xf]  ;;  %2503 = vmatpush3.bf16.msra.mxu0 %v2600_v46  ;;  %2526 = vmatpush3.bf16.msra.mxu1 %v2600_v46 }
  0x8b   : > { %v1307_v53 = vsel %vm2922_vm13, %v1302_v32, %v1306_v22  ;;  %v1206_v55 = vrot.slane %v1205_v34, 4  ;;  %v1321_v43 = vsel %vm2922_vm13, %v1316_v30, %v1320_v35  ;;  %v1325_v44 = vor.u32 %v1324_v31, %v1320_v35  ;;  %v553_v13 = vld [vmem:[#allocation2 + $0x18] sm:$0xf]  ;;  %v3141_v31 = vld [vmem:[#allocation2 + $0x20] sm:$0x1] }
  0x8c   : > { %1742 = vrot.lane.b32.xlu0 %v2415_v8, %s2663_s20  ;;  %v2426_v47 = vcombine.low %v1297_v26, %v1307_v53  ;;  %v1220_v48 = vrot.slane %v1219_v57, 4  ;;  %v1224_v49 = vrot.slane %v1222_v39, 5  ;;  %v1232_v51 = vshll.u32 %v3094_v25, 16 }
  0x8d   : > { %v1211_v54 = vsel %vm2922_vm13, %v1206_v55, %v1210_v28  ;;  %v1326_v16 = vrot.slane %v1325_v44, 4  ;;  %v2362_v56 = vrot.slane %v1384_v41, 9  ;;  %v1442_v58 = vrot.slane %v3034_v45, 5 }
  0x8e   : > { %1788 = vrot.lane.b32.xlu1 %v2426_v47, %s2664_s25  ;;  %v2422_v61 = vcombine.low %v1201_v33, %v1211_v54  ;;  %v1225_v62 = vsel %vm2922_vm13, %v1220_v48, %v1224_v49  ;;  %v1229_v0 = vor.u32 %v1228_v40, %v1224_v49  ;;  %v1234_v1 = vrot.slane %v1232_v51, 5  ;;  %v1381_v49 = vld [vmem:[#allocation2 + $0x24] sm:$0xe] }
  0x8f   : > { %v1331_v7 = vsel %vm2922_vm13, %v1326_v16, %v1330_v37  ;;  %v1443_v45 = vsel %vm2886_vm10, %v2362_v56, %v1442_v58  ;;  %v1444_v8 = vrot.slane %v1442_v58, 4  ;;  %v1445_v9 = vrot.slane %v3070_v63, 5  ;;  %v1385_v37 = vld [vmem:[#allocation2 + $0x54] sm:$0xe] }
  0x90   : > { %1780 = vrot.lane.b32.xlu0 %v2422_v61, %s2664_s25  ;;  %v2427_v14 = vcombine.low %v1321_v43, %v1331_v7  ;;  %v1230_v15 = vrot.slane %v1229_v0, 4  ;;  %v2358_v18 = vrot.slane %v1380_v60, 9  ;;  %v1414_v3 = vrot.slane %v3045_v36, 5  ;;  %v3152_v58 = vld [vmem:[#allocation2 + $0x54] sm:$0xf] }
  0x91   : > { %v1446_v19 = vsel %vm2886_vm10, %v1444_v8, %v1445_v9  ;;  %v1417_v20 = vrot.slane %v3077_v11, 5  ;;  %v721_v21 = vshrl.u32 %v561_v59, 16  ;;  %v724_v22 = vshll.u32 %v561_v59, 16  ;;  %v3135_v11 = vld [vmem:[#allocation2 + $0x1c] sm:$0xf] }
  0x92   : > { %1790 = vrot.lane.b32.xlu1 %v2427_v14, %s2664_s25  ;;  %v1235_v63 = vsel %vm2922_vm13, %v1230_v15, %v1234_v1  ;;  %v2434_v38 = vcombine.low %v1443_v45, %v1446_v19  ;;  %v1415_v23 = vsel %vm2886_vm10, %v2358_v18, %v1414_v3  ;;  %v1416_v24 = vrot.slane %v1414_v3, 4  ;;  %v3165_v14 = vld [vmem:[#allocation2 + $0x5c] sm:$0x1]  ;;  %v3170_v19 = vld [vmem:[#allocation2 + $0x24] sm:$0xf] }
  0x93   : > { %v2423_v36 = vcombine.low %v1225_v62, %v1235_v63  ;;  %v723_v26 = vrot.slane %v721_v21, 4  ;;  %v726_v27 = vrot.slane %v724_v22, 5  ;;  %v730_v17 = vshll.u32 %v3115_v6, 16 }
  0x94   : > { %v1418_v4 = vsel %vm2886_vm10, %v1416_v24, %v1417_v20  ;;  %v734_v28 = vshrl.u32 %v3115_v6, 16  ;;  %v740_v30 = vshll.u32 %v3122_v29, 16  ;;  %v625_v10 = vshrl.u32 %v553_v13, 16 }
  0x95   : > { %1782 = vrot.lane.b32.xlu0 %v2423_v36, %s2664_s25  ;;  %v2430_v32 = vcombine.low %v1415_v23, %v1418_v4  ;;  %v727_v33 = vor.u32 %v726_v27, %v723_v26  ;;  %v732_v34 = vrot.slane %v730_v17, 5  ;;  %v628_v35 = vshll.u32 %v553_v13, 16  ;;  %v3163_v13 = vld [vmem:[#allocation2 + $0x58] sm:$0xf]  ;;  %v3181_v36 = vld [vmem:[#allocation2 + $0x28] sm:$0xf] }
  0x96   : > { %1828 = vrot.lane.b32.xlu1 %v2434_v38, %s2665_s26  ;;  %v736_v57 = vrot.slane %v734_v28, 4  ;;  %v742_v39 = vrot.slane %v740_v30, 5  ;;  %v627_v40 = vrot.slane %v625_v10, 4  ;;  %v634_v41 = vshll.u32 %v3135_v11, 16  ;;  %v3185_v4 = vld [vmem:[#allocation2 + $0x2c] sm:$0x1] }
  0x97   : > { %v728_v42 = vrot.slane %v727_v33, 4  ;;  %v630_v53 = vrot.slane %v628_v35, 5  ;;  %v638_v55 = vshrl.u32 %v3135_v11, 16  ;;  %v644_v43 = vshll.u32 %v3141_v31, 16  ;;  %v774_v30 = vld [vmem:[#allocation2 + $0x48] sm:$0xe] }
  0x98   : > { %v737_v44 = vor.u32 %v736_v57, %v732_v34  ;;  %v636_v46 = vrot.slane %v634_v41, 5  ;;  %v2363_v47 = vrot.slane %v1385_v37, 9  ;;  %v1449_v48 = vrot.slane %v3051_v52, 5 }
  0x99   : > { %1820 = vrot.lane.b32.xlu0 %v2430_v32, %s2665_s26  ;;  %v733_v51 = vsel %vm2922_vm13, %v728_v42, %v732_v34  ;;  %v631_v54 = vor.u32 %v630_v53, %v627_v40  ;;  %v640_v16 = vrot.slane %v638_v55, 4  ;;  %v646_v56 = vrot.slane %v644_v43, 5 }
  0x9a   : > { %v738_v60 = vrot.slane %v737_v44, 4  ;;  %v1450_v61 = vsel %vm2886_vm10, %v2363_v47, %v1449_v48  ;;  %v1451_v62 = vrot.slane %v1449_v48, 4  ;;  %v1452_v0 = vrot.slane %v3083_v2, 5  ;;  %v770_v47 = vld [vmem:[#allocation2 + $0x18] sm:$0xe] }
  0x9b   : > { %v632_v1 = vrot.slane %v631_v54, 4  ;;  %v641_v52 = vor.u32 %v640_v16, %v636_v46  ;;  %v2359_v59 = vrot.slane %v1381_v49, 9  ;;  %v1421_v7 = vrot.slane %v3063_v50, 5 }
  0x9c   : > { %v743_v45 = vsel %vm2922_vm13, %v738_v60, %v742_v39  ;;  %v1453_v8 = vsel %vm2886_vm10, %v1451_v62, %v1452_v0  ;;  %v1424_v9 = vrot.slane %v3094_v25, 5  ;;  %v745_v15 = vshrl.u32 %v3152_v58, 16 }
  0x9d   : > { %v2380_v2 = vcombine.low %v733_v51, %v743_v45  ;;  %v637_v18 = vsel %vm2922_vm13, %v632_v1, %v636_v46  ;;  %v642_v3 = vrot.slane %v641_v52, 4  ;;  %v2435_v50 = vcombine.low %v1450_v61, %v1453_v8  ;;  %v775_v52 = vld [vmem:[#allocation2 + $0x54] sm:$0xe]  ;;  %v771_v8 = vld [vmem:[#allocation2 + $0x24] sm:$0xe] }
  0x9e   : > { %v1422_v20 = vsel %vm2886_vm10, %v2359_v59, %v1421_v7  ;;  %v1423_v21 = vrot.slane %v1421_v7, 4  ;;  %v747_v22 = vrot.slane %v745_v15, 4  ;;  %v748_v25 = vshll.u32 %v3152_v58, 16 }
  0x9f   : > { %1536 = vrot.lane.b32.xlu1 %v2380_v2, %s2659_s11  ;;  %v647_v63 = vsel %vm2922_vm13, %v642_v3, %v646_v56  ;;  %v754_v38 = vshll.u32 %v3163_v13, 16  ;;  %v758_v23 = vshrl.u32 %v3163_v13, 16  ;;  %v764_v24 = vshll.u32 %v3165_v14, 16 }
  0xa0   : > { %v2376_v26 = vcombine.low %v637_v18, %v647_v63  ;;  %v1425_v27 = vsel %vm2886_vm10, %v1423_v21, %v1424_v9  ;;  %v750_v17 = vrot.slane %v748_v25, 5  ;;  %v649_v28 = vshrl.u32 %v3170_v19, 16 }
  0xa1   : > { %v2431_v10 = vcombine.low %v1422_v20, %v1425_v27  ;;  %v756_v32 = vrot.slane %v754_v38, 5  ;;  %v760_v33 = vrot.slane %v758_v23, 4  ;;  %v766_v34 = vrot.slane %v764_v24, 5  ;;  %v3219_v23 = vld [vmem:[#allocation2 + $0x58] sm:$0xf] }
  0xa2   : > { %1528 = vrot.lane.b32.xlu0 %v2376_v26, %s2659_s11  ;;  %v751_v35 = vor.u32 %v750_v17, %v747_v22  ;;  %v651_v37 = vrot.slane %v649_v28, 4  ;;  %v652_v57 = vshll.u32 %v3170_v19, 16  ;;  %v658_v39 = vshll.u32 %v3181_v36, 16  ;;  %v871_v22 = vld [vmem:[#allocation2 + $0x54] sm:$0xf] }
  0xa3   : > { %1830 = vrot.lane.b32.xlu1 %v2435_v50, %s2665_s26  ;;  %v761_v40 = vor.u32 %v760_v33, %v756_v32  ;;  %v662_v41 = vshrl.u32 %v3181_v36, 16  ;;  %v668_v42 = vshll.u32 %v3185_v4, 16  ;;  %v2348_v53 = vrot.slane %v774_v30, 9  ;;  %v3223_v28 = vld [vmem:[#allocation2 + $0x24] sm:$0xf] }
  0xa4   : > { %v752_v55 = vrot.slane %v751_v35, 4  ;;  %v654_v43 = vrot.slane %v652_v57, 5  ;;  %v660_v44 = vrot.slane %v658_v39, 5  ;;  %v847_v46 = vrot.slane %v3115_v6, 5  ;;  %v3228_v33 = vld [vmem:[#allocation2 + $0x28] sm:$0xf] }
  0xa5   : > { %v762_v48 = vrot.slane %v761_v40, 4  ;;  %v664_v49 = vrot.slane %v662_v41, 4  ;;  %v670_v51 = vrot.slane %v668_v42, 5  ;;  %v850_v54 = vrot.slane %v3122_v29, 5  ;;  %v873_v39 = vld [vmem:[#allocation2 + $0x60] sm:$0xf] }
  0xa6   : > { %1822 = vrot.lane.b32.xlu0 %v2431_v10, %s2665_s26  ;;  %v757_v16 = vsel %vm2922_vm13, %v752_v55, %v756_v32  ;;  %v655_v56 = vor.u32 %v654_v43, %v651_v37  ;;  %v848_v60 = vsel %vm2886_vm10, %v2348_v53, %v847_v46  ;;  %v849_v61 = vrot.slane %v847_v46, 4  ;;  %v3239_v53 = vld [vmem:[#allocation2 + $0x64] sm:$0xf]  ;;  %v3241_v55 = vld [vmem:[#allocation2 + $0x30] sm:$0xf] }
  0xa7   : > { %v767_v62 = vsel %vm2922_vm13, %v762_v48, %v766_v34  ;;  %v665_v6 = vor.u32 %v664_v49, %v660_v44  ;;  %v2344_v0 = vrot.slane %v770_v47, 9  ;;  %v819_v1 = vrot.slane %v3135_v11, 5  ;;  %v3245_v48 = vld [vmem:[#allocation2 + $0x34] sm:$0xf] }
  0xa8   : > { %v2381_v59 = vcombine.low %v757_v16, %v767_v62  ;;  %v656_v29 = vrot.slane %v655_v56, 4  ;;  %v851_v7 = vsel %vm2886_vm10, %v849_v61, %v850_v54  ;;  %v822_v45 = vrot.slane %v3141_v31, 5 }
  0xa9   : > { %v666_v9 = vrot.slane %v665_v6, 4  ;;  %v2388_v15 = vcombine.low %v848_v60, %v851_v7  ;;  %v820_v2 = vsel %vm2886_vm10, %v2344_v0, %v819_v1  ;;  %v821_v18 = vrot.slane %v819_v1, 4  ;;  %v3254_v6 = vld [vmem:[#allocation2 + $0x5c] sm:$0x1] }
  0xaa   : > { %1538 = vrot.lane.b32.xlu1 %v2381_v59, %s2659_s11  ;;  %v661_v3 = vsel %vm2922_vm13, %v656_v29, %v660_v44  ;;  %v2349_v50 = vrot.slane %v775_v52, 9  ;;  %v854_v20 = vrot.slane %v3163_v13, 5  ;;  %v857_v21 = vrot.slane %v3165_v14, 5 }
  0xab   : > { %v671_v31 = vsel %vm2922_vm13, %v666_v9, %v670_v51  ;;  %v823_v25 = vsel %vm2886_vm10, %v821_v18, %v822_v45  ;;  %v2345_v63 = vrot.slane %v771_v8, 9  ;;  %v826_v38 = vrot.slane %v3181_v36, 5  ;;  %v3261_v9 = vld [vmem:[#allocation2 + $0x2c] sm:$0x1] }
  0xac   : > { %v2377_v24 = vcombine.low %v661_v3, %v671_v31  ;;  %v2384_v26 = vcombine.low %v820_v2, %v823_v25  ;;  %v855_v27 = vsel %vm2886_vm10, %v2349_v50, %v854_v20  ;;  %v856_v17 = vrot.slane %v854_v20, 4  ;;  %v3267_v31 = vld [vmem:[#allocation2 + $0x68] sm:$0x1] }
  0xad   : > { %v827_v14 = vsel %vm2886_vm10, %v2345_v63, %v826_v38  ;;  %v828_v30 = vrot.slane %v826_v38, 4  ;;  %v829_v10 = vrot.slane %v3185_v4, 5  ;;  %v1028_v32 = vshrl.u32 %v871_v22, 16 }
  0xae   : > { %1530 = vrot.lane.b32.xlu0 %v2377_v24, %s2659_s11  ;;  %1576 = vrot.lane.b32.xlu1 %v2388_v15, %s2658_s10  ;;  %v858_v34 = vsel %vm2886_vm10, %v856_v17, %v857_v21  ;;  %v1031_v35 = vshll.u32 %v871_v22, 16  ;;  %v1041_v37 = vshrl.u32 %v3219_v23, 16  ;;  %v2396_v57 = vcombine.low %v871_v22, %v3219_v23 }
  0xaf   : > { %v2389_v40 = vcombine.low %v855_v27, %v858_v34  ;;  %v830_v4 = vsel %vm2886_vm10, %v828_v30, %v829_v10  ;;  %v1030_v41 = vrot.slane %v1028_v32, 4  ;;  %v932_v42 = vshrl.u32 %v3223_v28, 16 }
  0xb0   : > { %v2385_v43 = vcombine.low %v827_v14, %v830_v4  ;;  %v1033_v44 = vrot.slane %v1031_v35, 5  ;;  %v935_v46 = vshll.u32 %v3223_v28, 16  ;;  %v945_v47 = vshrl.u32 %v3228_v33, 16 }
  0xb1   : > { %v934_v49 = vrot.slane %v932_v42, 4  ;;  %v2392_v51 = vcombine.low %v3223_v28, %v3228_v33  ;;  %v1052_v54 = vshrl.u32 %v873_v39, 16  ;;  %v1055_v16 = vshll.u32 %v873_v39, 16 }
  0xb2   : > { %1568 = vrot.lane.b32.xlu0 %v2384_v26, %s2658_s10  ;;  %1578 = vrot.lane.b32.xlu1 %v2389_v40, %s2658_s10  ;;  %v937_v56 = vrot.slane %v935_v46, 5  ;;  %v1065_v60 = vshrl.u32 %v3239_v53, 16  ;;  %v2397_v61 = vcombine.low %v873_v39, %v3239_v53  ;;  %v956_v62 = vshrl.u32 %v3241_v55, 16  ;;  %v3278_v39 = vld [vmem:[#allocation2 + $0x38] sm:$0x1] }
  0xb3   : > { %v1054_v0 = vrot.slane %v1052_v54, 4  ;;  %v1057_v1 = vrot.slane %v1055_v16, 5  ;;  %v959_v52 = vshll.u32 %v3241_v55, 16  ;;  %v969_v59 = vshrl.u32 %v3245_v48, 16 }
  0xb4   : > { %v958_v29 = vrot.slane %v956_v62, 4  ;;  %v2393_v7 = vcombine.low %v3241_v55, %v3245_v48  ;;  %v1034_v45 = vor.u32 %v1033_v44, %v1030_v41  ;;  %v1037_v8 = vshll.u32 %v3219_v23, 16  ;;  %v1081_v55 = vld [vmem:[#allocation2 + $0x54] sm:$0xe] }
  0xb5   : > { %v961_v15 = vrot.slane %v959_v52, 5  ;;  %v1043_v2 = vrot.slane %v1041_v37, 4  ;;  %v1047_v18 = vshll.u32 %v3254_v6, 16  ;;  %v938_v3 = vor.u32 %v937_v56, %v934_v49 }
  0xb6   : > { %1570 = vrot.lane.b32.xlu0 %v2385_v43, %s2658_s10  ;;  %1624 = vrot.lane.b32.xlu1 %v2396_v57, %s2660_s12  ;;  %v1035_v50 = vrot.slane %v1034_v45, 4  ;;  %v1039_v20 = vrot.slane %v1037_v8, 5  ;;  %v941_v21 = vshll.u32 %v3228_v33, 16  ;;  %v947_v22 = vrot.slane %v945_v47, 4  ;;  %v1082_v45 = vld [vmem:[#allocation2 + $0x60] sm:$0xe] }
  0xb7   : > { %v1049_v25 = vrot.slane %v1047_v18, 5  ;;  %v939_v63 = vrot.slane %v938_v3, 4  ;;  %v951_v38 = vshll.u32 %v3261_v9, 16  ;;  %v1058_v24 = vor.u32 %v1057_v1, %v1054_v0  ;;  %v1077_v0 = vld [vmem:[#allocation2 + $0x24] sm:$0xe] }
  0xb8   : > { %v1040_v26 = vsel %vm2922_vm13, %v1035_v50, %v1039_v20  ;;  %v1044_v27 = vor.u32 %v1043_v2, %v1039_v20  ;;  %v943_v17 = vrot.slane %v941_v21, 5  ;;  %v1061_v28 = vshll.u32 %v3239_v53, 16 }
  0xb9   : > { %v953_v14 = vrot.slane %v951_v38, 5  ;;  %v1059_v30 = vrot.slane %v1058_v24, 4  ;;  %v1067_v10 = vrot.slane %v1065_v60, 4  ;;  %v1071_v32 = vshll.u32 %v3267_v31, 16 }
  0xba   : > { %1616 = vrot.lane.b32.xlu0 %v2392_v51, %s2660_s12  ;;  %1626 = vrot.lane.b32.xlu1 %v2397_v61, %s2660_s12  ;;  %v1045_v34 = vrot.slane %v1044_v27, 4  ;;  %v944_v35 = vsel %vm2922_vm13, %v939_v63, %v943_v17  ;;  %v948_v37 = vor.u32 %v947_v22, %v943_v17  ;;  %v1063_v57 = vrot.slane %v1061_v28, 5  ;;  %v1078_v63 = vld [vmem:[#allocation2 + $0x30] sm:$0xe] }
  0xbb   : > { %v1073_v40 = vrot.slane %v1071_v32, 5  ;;  %v962_v4 = vor.u32 %v961_v15, %v958_v29  ;;  %v965_v41 = vshll.u32 %v3245_v48, 16  ;;  %v971_v42 = vrot.slane %v969_v59, 4 }
  0xbc   : > { %v1050_v43 = vsel %vm2922_vm13, %v1045_v34, %v1049_v25  ;;  %v949_v44 = vrot.slane %v948_v37, 4  ;;  %v1064_v46 = vsel %vm2922_vm13, %v1059_v30, %v1063_v57  ;;  %v1068_v47 = vor.u32 %v1067_v10, %v1063_v57  ;;  %v3318_v34 = vld [vmem:[#allocation2 + $0x30] sm:$0xf] }
  0xbd   : > { %v2404_v49 = vcombine.low %v1040_v26, %v1050_v43  ;;  %v963_v51 = vrot.slane %v962_v4, 4  ;;  %v967_v54 = vrot.slane %v965_v41, 5  ;;  %v975_v16 = vshll.u32 %v3278_v39, 16  ;;  %v1176_v26 = vld [vmem:[#allocation2 + $0x60] sm:$0xf] }
  0xbe   : > { %1618 = vrot.lane.b32.xlu0 %v2393_v7, %s2660_s12  ;;  %v954_v56 = vsel %vm2922_vm13, %v949_v44, %v953_v14  ;;  %v1069_v60 = vrot.slane %v1068_v47, 4  ;;  %v2356_v61 = vrot.slane %v1081_v55, 9  ;;  %v1151_v62 = vrot.slane %v3219_v23, 5  ;;  %v1178_v55 = vld [vmem:[#allocation2 + $0x6c] sm:$0xf] }
  0xbf   : > { %1664 = vrot.lane.b32.xlu1 %v2404_v49, %s2661_s13  ;;  %v2400_v1 = vcombine.low %v944_v35, %v954_v56  ;;  %v968_v52 = vsel %vm2922_vm13, %v963_v51, %v967_v54  ;;  %v972_v59 = vor.u32 %v971_v42, %v967_v54  ;;  %v977_v29 = vrot.slane %v975_v16, 5  ;;  %v3331_v43 = vld [vmem:[#allocation2 + $0x70] sm:$0xf]  ;;  %v3335_v51 = vld [vmem:[#allocation2 + $0x3c] sm:$0xf] }
  0xc0   : > { %v1074_v7 = vsel %vm2922_vm13, %v1069_v60, %v1073_v40  ;;  %v1152_v8 = vsel %vm2886_vm10, %v2356_v61, %v1151_v62  ;;  %v1153_v15 = vrot.slane %v1151_v62, 4  ;;  %v1154_v2 = vrot.slane %v3254_v6, 5  ;;  %v3323_v40 = vld [vmem:[#allocation2 + $0x34] sm:$0xf]  ;;  %v3343_v61 = vld [vmem:[#allocation2 + $0x40] sm:$0xf] }
  0xc1   : > { %v2405_v23 = vcombine.low %v1064_v46, %v1074_v7  ;;  %v973_v18 = vrot.slane %v972_v59, 4  ;;  %v2352_v3 = vrot.slane %v1077_v0, 9  ;;  %v1123_v50 = vrot.slane %v3228_v33, 5 }
  0xc2   : > { %1656 = vrot.lane.b32.xlu0 %v2400_v1, %s2661_s13  ;;  %v1155_v20 = vsel %vm2886_vm10, %v1153_v15, %v1154_v2  ;;  %v1126_v21 = vrot.slane %v3261_v9, 5  ;;  %v2357_v22 = vrot.slane %v1082_v45, 9  ;;  %v1158_v25 = vrot.slane %v3239_v53, 5  ;;  %v3312_v53 = vld [vmem:[#allocation2 + $0x64] sm:$0xf] }
  0xc3   : > { %1666 = vrot.lane.b32.xlu1 %v2405_v23, %s2661_s13  ;;  %v978_v6 = vsel %vm2922_vm13, %v973_v18, %v977_v29  ;;  %v2412_v38 = vcombine.low %v1152_v8, %v1155_v20  ;;  %v1124_v33 = vsel %vm2886_vm10, %v2352_v3, %v1123_v50  ;;  %v1125_v24 = vrot.slane %v1123_v50, 4  ;;  %v3350_v8 = vld [vmem:[#allocation2 + $0x68] sm:$0x1] }
  0xc4   : > { %v2401_v27 = vcombine.low %v968_v52, %v978_v6  ;;  %v1159_v17 = vsel %vm2886_vm10, %v2357_v22, %v1158_v25  ;;  %v1160_v9 = vrot.slane %v1158_v25, 4  ;;  %v1161_v28 = vrot.slane %v3267_v31, 5 }
  0xc5   : > { %v1127_v14 = vsel %vm2886_vm10, %v1125_v24, %v1126_v21  ;;  %v2353_v30 = vrot.slane %v1078_v63, 9  ;;  %v1130_v10 = vrot.slane %v3245_v48, 5  ;;  %v1133_v32 = vrot.slane %v3278_v39, 5  ;;  %v3325_v4 = vpop.permute.xlu1 %1572  ;;  %v3361_v63 = vld [vmem:[#allocation2 + $0x38] sm:$0x1] }
  0xc6   : > { %1658 = vrot.lane.b32.xlu0 %v2401_v27, %s2661_s13  ;;  %v2408_v35 = vcombine.low %v1124_v33, %v1127_v14  ;;  %v1162_v37 = vsel %vm2886_vm10, %v1160_v9, %v1161_v28  ;;  %v1333_v57 = vshrl.u32 %v1176_v26, 16  ;;  %v1336_v31 = vshll.u32 %v1176_v26, 16  ;;  %v3354_v3 = vpop.permute.xlu0 %1564  ;;  %v3367_v28 = vld [vmem:[#allocation2 + $0x74] sm:$0x1] }
  0xc7   : > { %1704 = vrot.lane.b32.xlu1 %v2412_v38, %s2662_s19  ;;  %v2413_v41 = vcombine.low %v1159_v17, %v1162_v37  ;;  %v1131_v48 = vsel %vm2886_vm10, %v2353_v30, %v1130_v10  ;;  %v1132_v39 = vrot.slane %v1130_v10, 4  ;;  %v1346_v42 = vshrl.u32 %v3312_v53, 16 }
  0xc8   : > { %v1335_v44 = vrot.slane %v1333_v57, 4  ;;  %v1338_v46 = vrot.slane %v1336_v31, 5  ;;  %v2420_v47 = vcombine.low %v1176_v26, %v3312_v53  ;;  %v1237_v49 = vshrl.u32 %v3318_v34, 16 }
  0xc9   : > { %v1134_v54 = vsel %vm2886_vm10, %v1132_v39, %v1133_v32  ;;  %v1240_v16 = vshll.u32 %v3318_v34, 16  ;;  %v1250_v56 = vshrl.u32 %v3323_v40, 16  ;;  %v2416_v60 = vcombine.low %v3318_v34, %v3323_v40  ;;  %v3356_v50 = vpop.permute.xlu1 %1574 }
  0xca   : > { %1696 = vrot.lane.b32.xlu0 %v2408_v35, %s2662_s19  ;;  %v2409_v62 = vcombine.low %v1131_v48, %v1134_v54  ;;  %v1239_v0 = vrot.slane %v1237_v49, 4  ;;  %v1357_v1 = vshrl.u32 %v1178_v55, 16  ;;  %v1360_v52 = vshll.u32 %v1178_v55, 16 }
  0xcb   : > { %1706 = vrot.lane.b32.xlu1 %v2413_v41, %s2662_s19  ;;  %v1242_v59 = vrot.slane %v1240_v16, 5  ;;  %v1370_v29 = vshrl.u32 %v3331_v43, 16  ;;  %v2421_v45 = vcombine.low %v1178_v55, %v3331_v43  ;;  %v1261_v7 = vshrl.u32 %v3335_v51, 16 }
  0xcc   : > { %v1359_v15 = vrot.slane %v1357_v1, 4  ;;  %v1362_v2 = vrot.slane %v1360_v52, 5  ;;  %v1264_v23 = vshll.u32 %v3335_v51, 16  ;;  %v1274_v18 = vshrl.u32 %v3343_v61, 16 }
  0xcd   : > { %v1263_v20 = vrot.slane %v1261_v7, 4  ;;  %v2417_v21 = vcombine.low %v3335_v51, %v3343_v61  ;;  %v1339_v22 = vor.u32 %v1338_v46, %v1335_v44  ;;  %v1342_v25 = vshll.u32 %v3312_v53, 16  ;;  %v3382_v51 = vld [vmem:[#allocation2 + $0x44] sm:$0x1] }
  0xce   : > { %1698 = vrot.lane.b32.xlu0 %v2409_v62, %s2662_s19  ;;  %v1266_v6 = vrot.slane %v1264_v23, 5  ;;  %v1348_v38 = vrot.slane %v1346_v42, 4  ;;  %v1352_v33 = vshll.u32 %v3350_v8, 16  ;;  %v1243_v24 = vor.u32 %v1242_v59, %v1239_v0  ;;  %v3375_v42 = vpop.permute.xlu0 %1566  ;;  %v1386_v62 = vld [vmem:[#allocation2 + $0x60] sm:$0xe] }
  0xcf   : > { %1752 = vrot.lane.b32.xlu1 %v2420_v47, %s2663_s20  ;;  %v1340_v26 = vrot.slane %v1339_v22, 4  ;;  %v1344_v27 = vrot.slane %v1342_v25, 5  ;;  %v1246_v17 = vshll.u32 %v3323_v40, 16  ;;  %v1252_v9 = vrot.slane %v1250_v56, 4  ;;  %v1382_v22 = vld [vmem:[#allocation2 + $0x30] sm:$0xe] }
  0xd0   : > { %v1354_v14 = vrot.slane %v1352_v33, 5  ;;  %v1244_v30 = vrot.slane %v1243_v24, 4  ;;  %v1256_v10 = vshll.u32 %v3361_v63, 16  ;;  %v1363_v32 = vor.u32 %v1362_v2, %v1359_v15 }
  0xd1   : > { %v1345_v34 = vsel %vm2922_vm13, %v1340_v26, %v1344_v27  ;;  %v1349_v35 = vor.u32 %v1348_v38, %v1344_v27  ;;  %v1248_v37 = vrot.slane %v1246_v17, 5  ;;  %v1366_v57 = vshll.u32 %v3331_v43, 16 }
  0xd2   : > { %1744 = vrot.lane.b32.xlu0 %v2416_v60, %s2663_s20  ;;  %v1258_v31 = vrot.slane %v1256_v10, 5  ;;  %v1364_v41 = vrot.slane %v1363_v32, 4  ;;  %v1372_v48 = vrot.slane %v1370_v29, 4  ;;  %v1376_v39 = vshll.u32 %v3367_v28, 16  ;;  %v3377_v55 = vpop.permute.xlu1 %1526  ;;  %v1387_v32 = vld [vmem:[#allocation2 + $0x6c] sm:$0xe] }
  0xd3   : > { %1754 = vrot.lane.b32.xlu1 %v2421_v45, %s2663_s20  ;;  %v1350_v44 = vrot.slane %v1349_v35, 4  ;;  %v1249_v46 = vsel %vm2922_vm13, %v1244_v30, %v1248_v37  ;;  %v1253_v47 = vor.u32 %v1252_v9, %v1248_v37  ;;  %v1368_v49 = vrot.slane %v1366_v57, 5  ;;  %v1383_v37 = vld [vmem:[#allocation2 + $0x3c] sm:$0xe] }
  0xd4   : > { %v1378_v54 = vrot.slane %v1376_v39, 5  ;;  %v1267_v16 = vor.u32 %v1266_v6, %v1263_v20  ;;  %v1270_v56 = vshll.u32 %v3343_v61, 16  ;;  %v1276_v60 = vrot.slane %v1274_v18, 4  ;;  %v3399_v24 = vpop.permute.xlu0 %1524 }
  0xd5   : > { %v1355_v0 = vsel %vm2922_vm13, %v1350_v44, %v1354_v14  ;;  %v1254_v1 = vrot.slane %v1253_v47, 4  ;;  %v1369_v52 = vsel %vm2922_vm13, %v1364_v41, %v1368_v49  ;;  %v1373_v59 = vor.u32 %v1372_v48, %v1368_v49 }
  0xd6   : > { %1746 = vrot.lane.b32.xlu0 %v2417_v21, %s2663_s20  ;;  %v2428_v29 = vcombine.low %v1345_v34, %v1355_v0  ;;  %v1268_v45 = vrot.slane %v1267_v16, 4  ;;  %v1272_v7 = vrot.slane %v1270_v56, 5  ;;  %v1280_v15 = vshll.u32 %v3382_v51, 16 }
  0xd7   : > { %v1259_v2 = vsel %vm2922_vm13, %v1254_v1, %v1258_v31  ;;  %v1374_v23 = vrot.slane %v1373_v59, 4  ;;  %v2364_v18 = vrot.slane %v1386_v62, 9  ;;  %v1456_v20 = vrot.slane %v3312_v53, 5  ;;  %v3394_v25 = vpop.permute.xlu1 %1534  ;;  %v2603_v59 = vld [vmem:[%s3606_s1 + $0x10] ss:$0 sps:$4 sm:$0x33]  }
  0xd8   : > { %1792 = vrot.lane.b32.xlu1 %v2428_v29, %s2664_s25  ;;  %v2424_v6 = vcombine.low %v1249_v46, %v1259_v2  ;;  %v1273_v21 = vsel %vm2922_vm13, %v1268_v45, %v1272_v7  ;;  %v1277_v38 = vor.u32 %v1276_v60, %v1272_v7  ;;  %v1282_v33 = vrot.slane %v1280_v15, 5 }
  0xd9   : > { %v1379_v26 = vsel %vm2922_vm13, %v1374_v23, %v1378_v54  ;;  %v1457_v27 = vsel %vm2886_vm10, %v2364_v18, %v1456_v20  ;;  %v1458_v53 = vrot.slane %v1456_v20, 4  ;;  %v1459_v17 = vrot.slane %v3350_v8, 5 }
  0xda   : > { %1784 = vrot.lane.b32.xlu0 %v2424_v6, %s2664_s25  ;;  %v2429_v9 = vcombine.low %v1369_v52, %v1379_v26  ;;  %v1278_v14 = vrot.slane %v1277_v38, 4  ;;  %v2360_v30 = vrot.slane %v1382_v22, 9  ;;  %v1428_v10 = vrot.slane %v3323_v40, 5  ;;  %v2607_v26 = vld [vmem:[#allocation2 + $0x30] sm:$0xf] }
  0xdb   : > { %v1460_v34 = vsel %vm2886_vm10, %v1458_v53, %v1459_v17  ;;  %v1431_v35 = vrot.slane %v3361_v63, 5  ;;  %v3411_v57 = vpop.permute.xlu1 %1620  ;;  %v2365_v39 = vrot.slane %v1387_v32, 9  ;;  %v1463_v63 = vrot.slane %v3331_v43, 5  ;;  %v2608_v17 = vld [vmem:[#allocation2 + $0x4] sm:$0xf] }
  0xdc   : > { %1794 = vrot.lane.b32.xlu1 %v2429_v9, %s2664_s25  ;;  %v1283_v8 = vsel %vm2922_vm13, %v1278_v14, %v1282_v33  ;;  %v2436_v31 = vcombine.low %v1457_v27, %v1460_v34  ;;  %v1429_v41 = vsel %vm2886_vm10, %v2360_v30, %v1428_v10  ;;  %v1430_v48 = vrot.slane %v1428_v10, 4  ;;  %v2606_v33 = vld [vmem:[#allocation2 + $0x34] sm:$0xf]  ;;  %v2609_v9 = vld [vmem:[#allocation2] sm:$0xf] }
  0xdd   : > { %v2425_v40 = vcombine.low %v1273_v21, %v1283_v8  ;;  %v1466_v46 = vrot.slane %v3367_v28, 5  ;;  %v2361_v47 = vrot.slane %v1383_v37, 9  ;;  %v1435_v54 = vrot.slane %v3343_v61, 5 }
  0xde   : > { %v1432_v44 = vsel %vm2886_vm10, %v1430_v48, %v1431_v35  ;;  %v1533_v49 = vpop.permute.xlu0 %1532  ;;  %v1438_v16 = vrot.slane %v3382_v51, 5  ;;  %v1464_v56 = vsel %vm2886_vm10, %v2365_v39, %v1463_v63  ;;  %v1465_v60 = vrot.slane %v1463_v63, 4  ;;  %v2610_v63 = vld [vmem:[#allocation2 + $0x40] sm:$0xf] }
  0xdf   : > { %1786 = vrot.lane.b32.xlu0 %v2425_v40, %s2664_s25  ;;  %v2432_v5 = vcombine.low %v1429_v41, %v1432_v44  ;;  %v1436_v43 = vsel %vm2886_vm10, %v2361_v47, %v1435_v54  ;;  %v1437_v62 = vrot.slane %v1435_v54, 4  ;;  %v3430_v28 = vpop.permute.xlu1 %1622  ;;  %vm2024_vm14 = vcmask 1041408  }
  0xe0   : > { %1832 = vrot.lane.b32.xlu1 %v2436_v31, %s2665_s26  ;;  %v1467_v0 = vsel %vm2886_vm10, %v1465_v60, %v1466_v46  ;;  %2528 = vmatprep.subr.msk.bf16.mxu0 %vm2024_vm14, %v2603_v59  ;;  %v2026_v7 = vsel %vm2024_vm14, %v2603_v59, 0  ;;  %v2370_v27 = vcombine.low %v2607_v26, %v2606_v33  ;;  %vm1836_vm15 = vcmask 31744   ;;  %v2611_v46 = vld [vmem:[#allocation2 + $0x3c] sm:$0xf]  ;;  %v2613_v60 = vld [vmem:[#allocation2 + $0xc] sm:$0xf] }
  0xe1   : > { %v2437_v61 = vcombine.low %v1464_v56, %v1467_v0  ;;  %v1439_v51 = vsel %vm2886_vm10, %v1437_v62, %v1438_v16  ;;  %2529 = vmatprep.subr.msk.bf16.mxu1 %vm2024_vm14, %v2603_v59  ;;  %2505 = vmatpush3.bf16.msra.mxu0 %v2026_v7  ;;  %v2366_v14 = vcombine.low %v2609_v9, %v2608_v17  ;;  %vm1878_vm1 = vcmask 97280   ;;  %v2612_v56 = vld [vmem:[#allocation2 + $0x10] sm:$0xf] }
  0xe2   : > { %v1613_v1 = vpop.permute.xlu0 %1612  ;;  %v2433_v52 = vcombine.low %v1436_v43, %v1439_v51  ;;  %2527 = vmatpush3.bf16.msra.mxu1 %v2026_v7  ;;  %v1851_v30 = vsel %vm1836_vm15, %v2370_v27, %v1533_v49  ;;  %vm1861_vm2 = vcmask 64512   ;;  %vm1895_vm3 = vcmask 130048  }
  0xe3   : > { %1824 = vrot.lane.b32.xlu0 %v2432_v5, %s2665_s26  ;;  %v1839_v34 = vsel %vm1836_vm15, %v2366_v14, %v3399_v24  ;;  %v1871_v35 = vsel %vm1861_vm2, %v1851_v30, %v3325_v4  ;;  %vm1912_vm4 = vcmask 162816   ;;  %vm1929_vm5 = vcmask 195584  }
  0xe4   : > { %1834 = vrot.lane.b32.xlu1 %v2437_v61, %s2665_s26  ;;  %v1888_v37 = vsel %vm1878_vm1, %v1871_v35, %v3411_v57  ;;  %vm1946_vm6 = vcmask 228352   ;;  %v1863_v41 = vsel %vm1861_vm2, %v1839_v34, %v3354_v3  ;;  %vm1963_vm7 = vcmask 261120  }
  0xe5   : > { %v1880_v24 = vsel %vm1878_vm1, %v1863_v41, %v1613_v1  ;;  %vm2007_vm8 = vcmask 293888   ;;  %v2371_v47 = vcombine.low %v2611_v46, %v2610_v63  ;;  %v2367_v43 = vcombine.low %v2613_v60, %v2612_v56 }
  0xe6   : > { %v3441_v29 = vpop.permute.xlu0 %1614  ;;  %v2369_v56 = vcombine.low %v3170_v19, %v3181_v36 }
  0xe7   : > { %1826 = vrot.lane.b32.xlu0 %v2433_v52, %s2665_s26  ;;  %v1661_v45 = vpop.permute.xlu1 %1660  ;;  %v1854_v0 = vsel %vm1836_vm15, %v2371_v47, %v3394_v25  ;;  %v1842_v1 = vsel %vm1836_vm15, %v2367_v43, %v3377_v55 }
  0xe8   : > { %v1905_v31 = vsel %vm1895_vm3, %v1888_v37, %v1661_v45  ;;  %v1873_v61 = vsel %vm1861_vm2, %v1854_v0, %v3356_v50  ;;  %v1865_v45 = vsel %vm1861_vm2, %v1842_v1, %v3375_v42 }
  0xe9   : > { %v1890_v51 = vsel %vm1878_vm1, %v1873_v61, %v3430_v28  ;;  %v1882_v25 = vsel %vm1878_vm1, %v1865_v45, %v3441_v29 }
  0xea   : > { %v1653_v12 = vpop.permute.xlu0 %1652 }
  0xeb   : > { %v1663_v15 = vpop.permute.xlu1 %1662  ;;  %v1897_v39 = vsel %vm1895_vm3, %v1880_v24, %v1653_v12  ;;  %v2614_v24 = vld [vmem:[#allocation2 + $0x48] sm:$0xf] }
  0xec   : > { %v1907_v59 = vsel %vm1895_vm3, %v1890_v51, %v1663_v15 }
  0xee   : > { %v3444_v2 = vpop.permute.xlu0 %1654 }
  0xef   : > { %v1701_v23 = vpop.permute.xlu1 %1700  ;;  %v1899_v50 = vsel %vm1895_vm3, %v1882_v25, %v3444_v2 }
  0xf0   : > { %v1922_v48 = vsel %vm1912_vm4, %v1905_v31, %v1701_v23 }
  0xf2   : > { %v1693_v18 = vpop.permute.xlu0 %1692 }
  0xf3   : > { %v1703_v20 = vpop.permute.xlu1 %1702  ;;  %v1914_v49 = vsel %vm1912_vm4, %v1897_v39, %v1693_v18 }
  0xf4   : > { %v1924_v7 = vsel %vm1912_vm4, %v1907_v59, %v1703_v20 }
  0xf6   : > { %v3446_v22 = vpop.permute.xlu0 %1694 }
  0xf7   : > { %v1749_v6 = vpop.permute.xlu1 %1748  ;;  %v1916_v15 = vsel %vm1912_vm4, %v1899_v50, %v3446_v22 }
  0xf8   : > { %v1939_v40 = vsel %vm1929_vm5, %v1922_v48, %v1749_v6 }
  0xfa   : > { %v1741_v21 = vpop.permute.xlu0 %1740 }
  0xfb   : > { %v1751_v38 = vpop.permute.xlu1 %1750  ;;  %v1931_v5 = vsel %vm1929_vm5, %v1914_v49, %v1741_v21  ;;  %v2373_v49 = vcombine.low %v3152_v58, %v3163_v13 }
  0xfc   : > { %v1941_v12 = vsel %vm1929_vm5, %v1924_v7, %v1751_v38 }
  0xfe   : > { %v1743_v53 = vpop.permute.xlu0 %1742 }
  0xff   : > { %v1933_v42 = vsel %vm1929_vm5, %v1916_v15, %v1743_v53 }
 0x100   : > { %v1789_v10 = vpop.permute.xlu1 %1788 }
 0x101   : > { %v1956_v57 = vsel %vm1946_vm6, %v1939_v40, %v1789_v10  ;;  %v2615_v40 = vld [vmem:[#allocation2 + $0x4c] sm:$0xf] }
 0x102   : > { %v1781_v32 = vpop.permute.xlu0 %1780 }
 0x103   : > { %v1948_v54 = vsel %vm1946_vm6, %v1931_v5, %v1781_v32 }
 0x104   : > { %v1791_v8 = vpop.permute.xlu1 %1790 }
 0x105   : > { %v1958_v23 = vsel %vm1946_vm6, %v1941_v12, %v1791_v8 }
 0x107   : > { %v1783_v4 = vpop.permute.xlu0 %1782 }
 0x108   : > { %v1829_v44 = vpop.permute.xlu1 %1828  ;;  %v1950_v29 = vsel %vm1946_vm6, %v1933_v42, %v1783_v4  ;;  %v2372_v4 = vcombine.low %v2614_v24, %v2615_v40 }
 0x109   : > { %v1973_v3 = vsel %vm1963_vm7, %v1956_v57, %v1829_v44  ;;  %v2616_v44 = vld [vmem:[#allocation2 + $0x18] sm:$0xf] }
 0x10a   : > { %2514 = vmatprep.mubr.msk.bf16.mxu1 %vm2007_vm8, %v1973_v3  ;;  %v2368_v63 = vcombine.low %v2616_v44, %v3135_v11 }
 0x10b   : > { %v1821_v16 = vpop.permute.xlu0 %1820 }
 0x10c   : > { %v1965_v62 = vsel %vm1963_vm7, %v1948_v54, %v1821_v16 }
 0x10d   : > { %2506 = vmatprep.mubr.msk.bf16.mxu0 %vm2007_vm8, %v1965_v62 }
 0x111   : > { %v1537_v52 = vpop.permute.xlu1 %1536 }
 0x112   : > { %v1857_v46 = vsel %vm1836_vm15, %v2372_v4, %v1537_v52 }
 0x114   : > { %v1529_v55 = vpop.permute.xlu0 %1528 }
 0x115   : > { %v1831_v28 = vpop.permute.xlu1 %1830  ;;  %v1845_v16 = vsel %vm1836_vm15, %v2368_v63, %v1529_v55 }
 0x116   : > { %v1975_v18 = vsel %vm1963_vm7, %v1958_v23, %v1831_v28 }
 0x117   : > { %2515 = vmatmul.mubr.msk.bf16.vlgmr.msra.gmra.mrb[0].mxu1 %vm2007_vm8, %v1975_v18 }
 0x118   : > { %v1823_v20 = vpop.permute.xlu0 %1822 }
 0x119   : > { %v1967_v6 = vsel %vm1963_vm7, %v1950_v29, %v1823_v20 }
 0x11a   : > { %2507 = vmatmul.mubr.msk.bf16.vlgmr.msra.gmra.mrb[0].mxu0 %vm2007_vm8, %v1967_v6 }
 0x11c   : > { %v1539_v2 = vpop.permute.xlu1 %1538 }
 0x11d   : > { %v1860_v62 = vsel %vm1836_vm15, %v2373_v49, %v1539_v2 }
 0x120   : > { %v1531_v21 = vpop.permute.xlu0 %1530  ;;  %v1577_v38 = vpop.permute.xlu1 %1576 }
 0x121   : > { %v1875_v3 = vsel %vm1861_vm2, %v1857_v46, %v1577_v38  ;;  %v1848_v36 = vsel %vm1836_vm15, %v2369_v56, %v1531_v21 }
 0x124   : > { %v1569_v33 = vpop.permute.xlu0 %1568  ;;  %v1579_v26 = vpop.permute.xlu1 %1578 }
 0x125   : > { %v1867_v11 = vsel %vm1861_vm2, %v1845_v16, %v1569_v33  ;;  %v1877_v1 = vsel %vm1861_vm2, %v1860_v62, %v1579_v26 }
 0x128   : > { %v1571_v27 = vpop.permute.xlu0 %1570  ;;  %v1625_v22 = vpop.permute.xlu1 %1624 }
 0x129   : > { %v1892_v5 = vsel %vm1878_vm1, %v1875_v3, %v1625_v22  ;;  %v1869_v7 = vsel %vm1861_vm2, %v1848_v36, %v1571_v27  ;;  %v3540_v27 = vld [vmem:[%s3607_s2] ss:$0 sm:$0xff] }
 0x12c   : > { %v1617_v17 = vpop.permute.xlu0 %1616  ;;  %v1627_v9 = vpop.permute.xlu1 %1626 }
 0x12d   : > { %v1884_v58 = vsel %vm1878_vm1, %v1867_v11, %v1617_v17  ;;  %v1894_v52 = vsel %vm1878_vm1, %v1877_v1, %v1627_v9 }
 0x130   : > { %v1619_v14 = vpop.permute.xlu0 %1618 }
 0x131   : > { %v1665_v53 = vpop.permute.xlu1 %1664  ;;  %v1886_v55 = vsel %vm1878_vm1, %v1869_v7, %v1619_v14 }
 0x132   : > { %v1909_v60 = vsel %vm1895_vm3, %v1892_v5, %v1665_v53 }
 0x134   : > { %v1657_v30 = vpop.permute.xlu0 %1656 }
 0x135   : > { %v1667_v10 = vpop.permute.xlu1 %1666  ;;  %v1901_v61 = vsel %vm1895_vm3, %v1884_v58, %v1657_v30 }
 0x136   : > { %v1911_v25 = vsel %vm1895_vm3, %v1894_v52, %v1667_v10 }
 0x138   : > { %v1659_v32 = vpop.permute.xlu0 %1658 }
 0x139   : > { %v1705_v34 = vpop.permute.xlu1 %1704  ;;  %v1903_v15 = vsel %vm1895_vm3, %v1886_v55, %v1659_v32 }
 0x13a   : > { %v1926_v43 = vsel %vm1912_vm4, %v1909_v60, %v1705_v34 }
 0x13c   : > { %v1697_v35 = vpop.permute.xlu0 %1696 }
 0x13d   : > { %v1707_v37 = vpop.permute.xlu1 %1706  ;;  %v1918_v59 = vsel %vm1912_vm4, %v1901_v61, %v1697_v35 }
 0x13e   : > { %v1928_v50 = vsel %vm1912_vm4, %v1911_v25, %v1707_v37 }
 0x140   : > { %v1699_v8 = vpop.permute.xlu0 %1698 }
 0x141   : > { %v1753_v31 = vpop.permute.xlu1 %1752  ;;  %v1920_v29 = vsel %vm1912_vm4, %v1903_v15, %v1699_v8 }
 0x142   : > { %v1943_v13 = vsel %vm1929_vm5, %v1926_v43, %v1753_v31 }
 0x144   : > { %v1745_v41 = vpop.permute.xlu0 %1744 }
 0x145   : > { %v1755_v48 = vpop.permute.xlu1 %1754  ;;  %v1935_v12 = vsel %vm1929_vm5, %v1918_v59, %v1745_v41 }
 0x146   : > { %v1945_v18 = vsel %vm1929_vm5, %v1928_v50, %v1755_v48 }
 0x148   : > { %v1747_v39 = vpop.permute.xlu0 %1746 }
 0x149   : > { %v1937_v2 = vsel %vm1929_vm5, %v1920_v29, %v1747_v39 }
 0x14a   : > { %v1793_v57 = vpop.permute.xlu1 %1792 }
 0x14b   : > { %v1960_v51 = vsel %vm1946_vm6, %v1943_v13, %v1793_v57 }
 0x14c   : > { %v1785_v47 = vpop.permute.xlu0 %1784 }
 0x14d   : > { %v1952_v23 = vsel %vm1946_vm6, %v1935_v12, %v1785_v47 }
 0x14e   : > { %v1795_v54 = vpop.permute.xlu1 %1794 }
 0x14f   : > { %v1962_v20 = vsel %vm1946_vm6, %v1945_v18, %v1795_v54 }
 0x151   : > { %v1787_v0 = vpop.permute.xlu0 %1786 }
 0x152   : > { %v1833_v19 = vpop.permute.xlu1 %1832  ;;  %v1954_v38 = vsel %vm1946_vm6, %v1937_v2, %v1787_v0 }
 0x153   : > { %v1977_v45 = vsel %vm1963_vm7, %v1960_v51, %v1833_v19 }
 0x154   : > { %2518 = vmatprep.mubr.msk.bf16.mxu1 %vm2007_vm8, %v1977_v45 }
 0x155   : > { %v1825_v28 = vpop.permute.xlu0 %1824 }
 0x156   : > { %v1969_v42 = vsel %vm1963_vm7, %v1952_v23, %v1825_v28  ;;  %v1835_v6 = vpop.permute.xlu1 %1834 }
 0x157   : > { %2510 = vmatprep.mubr.msk.bf16.mxu0 %vm2007_vm8, %v1969_v42  ;;  %v1979_v21 = vsel %vm1963_vm7, %v1962_v20, %v1835_v6 }
 0x158   : > { %2519 = vmatmul.mubr.msk.bf16.gmra.mrb[4].mxu1 %vm2007_vm8, %v1979_v21 }
 0x159   : > { %v1827_v33 = vpop.permute.xlu0 %1826 }
 0x15a   : > { %v1971_v26 = vsel %vm1963_vm7, %v1954_v38, %v1827_v33 }
 0x15b   : > { %2511 = vmatmul.mubr.msk.bf16.gmra.mrb[4].mxu0 %vm2007_vm8, %v1971_v26 }
 0x1ea   : > { %v2516_v22 = vpop.f32.mrb[0].mxu1 }
 0x1eb   : > { %v2103_v17 = vadd.f32 %v2516_v22, %v3540_v27  ;;  %v2094_v9 = vpop.f32.mrb[1].mxu1 }
 0x1ec   : > { %v2095_v14 = vadd.f32 %v3540_v27, %v2094_v9  ;;  %v2517_v53 = vpop.f32.mrb[2].mxu1 }
 0x1ed   : > { %v2508_v30 = vpop.f32.mrb[0].mxu0  ;;  %v2135_v10 = vmax.f32 %v2103_v17, 0.0  ;;  %v2106_v32 = vadd.f32 %v2517_v53, %v3540_v27  ;;  %v2097_v34 = vpop.f32.mrb[3].mxu1 }
 0x1ee   : > { %v2071_v35 = vadd.f32 %v2508_v30, %v3540_v27  ;;  %v2062_v37 = vpop.f32.mrb[1].mxu0  ;;  %v2133_v8 = vmax.f32 %v2095_v14, 0.0  ;;  %v2098_v31 = vadd.f32 %v3540_v27, %v2097_v34 }
 0x1ef   : > { %v2483_v41 = vpack.c.bf16 %v2135_v10, %v2135_v10  ;;  %v2063_v48 = vadd.f32 %v3540_v27, %v2062_v37  ;;  %v2509_v24 = vpop.f32.mrb[2].mxu0  ;;  %v2136_v40 = vmax.f32 %v2106_v32, 0.0 }
 0x1f0   : > { %v2127_v4 = vmax.f32 %v2071_v35, 0.0  ;;  %v2481_v39 = vpack.c.bf16 %v2133_v8, %v2133_v8  ;;  %v2074_v57 = vadd.f32 %v2509_v24, %v3540_v27  ;;  %v2065_v44 = vpop.f32.mrb[3].mxu0  ;;  %v2134_v63 = vmax.f32 %v2098_v31, 0.0 }
 0x1f1   : > { %2215 = vst.msk [vmem:[%s2773_s6 + $0x28] sm:$0xf] %vm198_vm0, %v2483_v41  ;;  %v2125_v46 = vmax.f32 %v2063_v48, 0.0  ;;  %v2484_v47 = vpack.c.bf16 %v2136_v40, %v2136_v40  ;;  %v2066_v49 = vadd.f32 %v3540_v27, %v2065_v44 }
 0x1f2   : > { %v2475_v3 = vpack.c.bf16 %v2127_v4, %v2127_v4  ;;  %2213 = vst.msk [vmem:[%s2773_s6 + $0x20] sm:$0xf] %vm198_vm0, %v2481_v39  ;;  %v2128_v5 = vmax.f32 %v2074_v57, 0.0  ;;  %v2482_v54 = vpack.c.bf16 %v2134_v63, %v2134_v63 }
 0x1f3   : > { %v2473_v16 = vpack.c.bf16 %v2125_v46, %v2125_v46  ;;  %2216 = vst.msk [vmem:[%s2773_s6 + $0x2c] sm:$0xf] %vm198_vm0, %v2484_v47  ;;  %v2126_v56 = vmax.f32 %v2066_v49, 0.0 }
 0x1f4   : > { %2207 = vst.msk [vmem:[%s2773_s6 + $0x8] sm:$0xf] %vm198_vm0, %v2475_v3  ;;  %v2476_v60 = vpack.c.bf16 %v2128_v5, %v2128_v5  ;;  %2214 = vst.msk [vmem:[%s2773_s6 + $0x24] sm:$0xf] %vm198_vm0, %v2482_v54 }
 0x1f5   : > { %2205 = vst.msk [vmem:[%s2773_s6] sm:$0xf] %vm198_vm0, %v2473_v16  ;;  %v2474_v11 = vpack.c.bf16 %v2126_v56, %v2126_v56 }
 0x1f6   : > { %2208 = vst.msk [vmem:[%s2773_s6 + $0xc] sm:$0xf] %vm198_vm0, %v2476_v60 }
 0x1f7   : > { %2206 = vst.msk [vmem:[%s2773_s6 + $0x4] sm:$0xf] %vm198_vm0, %v2474_v11 }
 0x22b   : > { %v2520_v43 = vpop.f32.mrb[4].mxu1 }
 0x22c   : > { %v2119_v62 = vadd.f32 %v2520_v43, %v3540_v27  ;;  %v2110_v58 = vpop.f32.mrb[5].mxu1 }
 0x22d   : > { %v2111_v0 = vadd.f32 %v3540_v27, %v2110_v58  ;;  %v2521_v1 = vpop.f32.mrb[6].mxu1 }
 0x22e   : > { %v2512_v13 = vpop.f32.mrb[4].mxu0  ;;  %v2139_v51 = vmax.f32 %v2119_v62, 0.0  ;;  %v2122_v36 = vadd.f32 %v2521_v1, %v3540_v27  ;;  %v2113_v52 = vpop.f32.mrb[7].mxu1 }
 0x22f   : > { %v2087_v61 = vadd.f32 %v2512_v13, %v3540_v27  ;;  %v2078_v19 = vpop.f32.mrb[5].mxu0  ;;  %v2137_v45 = vmax.f32 %v2111_v0, 0.0  ;;  %v2114_v25 = vadd.f32 %v3540_v27, %v2113_v52 }
 0x230   : > { %v2079_v59 = vadd.f32 %v3540_v27, %v2078_v19  ;;  %v2513_v7 = vpop.f32.mrb[6].mxu0  ;;  %v2487_v55 = vpack.c.bf16 %v2139_v51, %v2139_v51  ;;  %v2140_v23 = vmax.f32 %v2122_v36, 0.0 }
 0x231   : > { %v2131_v12 = vmax.f32 %v2087_v61, 0.0  ;;  %v2090_v50 = vadd.f32 %v2513_v7, %v3540_v27  ;;  %v2081_v28 = vpop.f32.mrb[7].mxu0  ;;  %v2485_v18 = vpack.c.bf16 %v2137_v45, %v2137_v45  ;;  %v2138_v29 = vmax.f32 %v2114_v25, 0.0 }
 0x232   : > { %v2129_v15 = vmax.f32 %v2079_v59, 0.0  ;;  %v2082_v42 = vadd.f32 %v3540_v27, %v2081_v28  ;;  %2219 = vst.msk [vmem:[%s2773_s6 + $0x38] sm:$0xf] %vm198_vm0, %v2487_v55  ;;  %v2488_v2 = vpack.c.bf16 %v2140_v23, %v2140_v23 }
 0x233   : > { %v2479_v20 = vpack.c.bf16 %v2131_v12, %v2131_v12  ;;  %v2132_v6 = vmax.f32 %v2090_v50, 0.0  ;;  %2217 = vst.msk [vmem:[%s2773_s6 + $0x30] sm:$0xf] %vm198_vm0, %v2485_v18  ;;  %v2486_v33 = vpack.c.bf16 %v2138_v29, %v2138_v29 }
 0x234   : > { %v2477_v21 = vpack.c.bf16 %v2129_v15, %v2129_v15  ;;  %v2130_v38 = vmax.f32 %v2082_v42, 0.0  ;;  %2220 = vst.msk [vmem:[%s2773_s6 + $0x3c] sm:$0xf] %vm198_vm0, %v2488_v2 }
 0x235   : > { %2211 = vst.msk [vmem:[%s2773_s6 + $0x18] sm:$0xf] %vm198_vm0, %v2479_v20  ;;  %v2480_v26 = vpack.c.bf16 %v2132_v6, %v2132_v6  ;;  %2218 = vst.msk [vmem:[%s2773_s6 + $0x34] sm:$0xf] %vm198_vm0, %v2486_v33 }
 0x236   : > { %2209 = vst.msk [vmem:[%s2773_s6 + $0x10] sm:$0xf] %vm198_vm0, %v2477_v21  ;;  %v2478_v27 = vpack.c.bf16 %v2130_v38, %v2130_v38 }
 0x237   : > { %2212 = vst.msk [vmem:[%s2773_s6 + $0x1c] sm:$0xf] %vm198_vm0, %v2480_v26 }
 0x238   : > { %2210 = vst.msk [vmem:[%s2773_s6 + $0x14] sm:$0xf] %vm198_vm0, %v2478_v27 }
 0x239 PF: > { %s13_s16 = sadd.s32 1, %s2655_s16   ;;  %s3619_s12 = smov %s2647_s14 }
 0x23a   : > { %p10_p9 = scmp.ge.s32.totalorder %s13_s16, 6   ;;  %s3620_s13 = smov %s2651_s15 }
 0x23b   : > { %s3621_s14 = smov %s3624_s17  ;;  %s3622_s15 = smov %s3628_s18 }
 0x23c   :  { %12 = sbr.rel (!%p10_p9) target bundleno = 3 (0x3), region = 76 }

</bundles_post_ra>
